<compile_context>
chip_gen: v6e
topology: v6e:2x2x1
jax: 0.10.0
libtpu: 0.0.40
codegen_flags: <defaults>
</compile_context>

<pallas_src>
import functools
import math

import jax
import jax.numpy as jnp
from jax.experimental import pallas as pl
from jax.experimental.pallas import tpu as pltpu


# ----------------------------------------------------------------------------- config
# Small-but-structurally-faithful version of the original:
#   conv1: Conv2d(1, C1, kernel (1,K), stride (1,K), pad (0,2), bias=False)   [256 -> 8]
#   ViT:   hidden 768->32, layers 12->2, heads 12->4, mlp 3072->64, patch (8,1)
CFG = dict(
    batch=2,
    eeg_h=17,       # "129" in the real model (odd: last row dropped by the patch conv)
    eeg_w=68,       # "500"
    conv_k=12,      # "36"
    conv_pad=2,
    c1=8,           # "256" conv1 out channels == ViT num_channels
    hidden=32,      # "768"
    layers=2,       # "12"
    heads=4,        # "12"
    inter=64,       # "3072"
    patch_h=8,      # patch_size = (8, 1)
    ln_eps=1e-12,   # ViTConfig default layer_norm_eps
    bn_eps=0.0,     # BatchNorm2d(256, False) -> eps=False==0.0 (positional-arg quirk)
)


# ----------------------------------------------------------------------- Pallas kernels
def _matmul_bias_kernel(a_ref, w_ref, b_ref, o_ref):
    """Full-block (M,K)@(K,N)+(1,N); bf16 operands, f32 accumulation."""
    acc = jnp.dot(a_ref[...].astype(jnp.bfloat16), w_ref[...],
                  preferred_element_type=jnp.float32)
    o_ref[...] = (acc + b_ref[...]).astype(o_ref.dtype)


def embed_matmul(rows, w_bf16, bias):
    """Fused conv1+BN+patch-embedding matmul: rows (M, ph*K) @ (ph*K, H) + (H,)."""
    M, K = rows.shape
    N = w_bf16.shape[1]
    return pl.pallas_call(
        _matmul_bias_kernel,
        out_shape=jax.ShapeDtypeStruct((M, N), jnp.float32),
        grid=(1,),
        in_specs=[pl.BlockSpec((M, K), lambda i: (0, 0)),
                  pl.BlockSpec((K, N), lambda i: (0, 0)),
                  pl.BlockSpec((1, N), lambda i: (0, 0))],
        out_specs=pl.BlockSpec((M, N), lambda i: (0, 0)),
    )(rows, w_bf16, bias.reshape(1, N))


def _encoder_kernel(hseq_ref,
                    ln1g_ref, ln1b_ref,
                    wqkv_ref, bqkv_ref,
                    wo_ref, bo_ref,
                    ln2g_ref, ln2b_ref,
                    wi_ref, bi_ref,
                    wo2_ref, bo2_ref,
                    fing_ref, finb_ref,
                    poolw_ref, poolb_ref,
                    headw_ref, headb_ref,
                    out_ref,
                    h_scr,
                    *, heads, ln_eps):
    """One grid step = (one batch element, one encoder layer).

    Activations stay resident in the VMEM scratch `h_scr` (f32) across the layer axis;
    per-layer weights are streamed via their BlockSpec index_maps.  At the last layer the
    final LayerNorm (CLS row only), pooler dense and the replaced Linear(H,2) head run in-kernel.
    """
    l = pl.program_id(1)
    n_layers = pl.num_programs(1)
    bf16, f32 = jnp.bfloat16, jnp.float32

    @pl.when(l == 0)
    def _init():
        h_scr[...] = hseq_ref[0].astype(f32)

    h = h_scr[...]                               # (S, H) f32
    S, H = h.shape
    Dh = H // heads
    scale = 1.0 / math.sqrt(Dh)

    def layer_norm(x, g, b):                     # f32 statistics
        m = jnp.mean(x, axis=-1, keepdims=True)
        xc = x - m
        v = jnp.mean(xc * xc, axis=-1, keepdims=True)
        return xc * jax.lax.rsqrt(v + ln_eps) * g + b

    # ---- self-attention block (pre-LN); LN fused into the single QKV matmul ----
    n1 = layer_norm(h, ln1g_ref[0], ln1b_ref[0])                       # (S, H)
    qkv = jnp.dot(n1.astype(bf16), wqkv_ref[0],
                  preferred_element_type=f32) + bqkv_ref[0]            # (S, 3H)
    attn = jnp.zeros((S, H), f32)
    for hd in range(heads):                       # unrolled; per-head output-projection accumulate
        qh = qkv[:, hd * Dh:(hd + 1) * Dh].astype(bf16)
        kh = qkv[:, H + hd * Dh:H + (hd + 1) * Dh].astype(bf16)
        vh = qkv[:, 2 * H + hd * Dh:2 * H + (hd + 1) * Dh].astype(bf16)
        s = jax.lax.dot_general(qh, kh, (((1,), (1,)), ((), ())),
                                preferred_element_type=f32) * scale    # (S, S)
        s = s - jnp.max(s, axis=-1, keepdims=True)
        p = jnp.exp(s)
        p = p * pl.reciprocal(jnp.sum(p, axis=-1, keepdims=True), approx=True)
        # TODO(synk): attention_probs dropout (p=0.1) not applied (inference mode).
        ctx = jnp.dot(p.astype(bf16), vh, preferred_element_type=f32)  # (S, Dh)
        attn = attn + jnp.dot(ctx.astype(bf16), wo_ref[0, hd],
                              preferred_element_type=f32)              # += ctx_h @ Wo[rows of head]
    h = h + attn + bo_ref[0]

    # ---- MLP block (pre-LN); GELU fused into the matmul epilogue ----
    n2 = layer_norm(h, ln2g_ref[0], ln2b_ref[0])
    inter = jnp.dot(n2.astype(bf16), wi_ref[0],
                    preferred_element_type=f32) + bi_ref[0]            # (S, I)
    # TODO(synk): tanh-approx GELU used in-kernel; HF ViT hidden_act="gelu" is exact erf.
    c = 0.7978845608028654
    inter = 0.5 * inter * (1.0 + jnp.tanh(c * (inter + 0.044715 * inter * inter * inter)))
    mlp = jnp.dot(inter.astype(bf16), wo2_ref[0],
                  preferred_element_type=f32) + bo2_ref[0]
    h = h + mlp
    h_scr[...] = h

    # ---- final LayerNorm (CLS row only) + pooler dense + replaced Dropout/Linear(H,2) head ----
    @pl.when(l == n_layers - 1)
    def _head():
        cls = layer_norm(h[0:1, :], fing_ref[...], finb_ref[...])      # (1, H)
        pooled = jnp.dot(cls.astype(bf16), poolw_ref[...],
                         preferred_element_type=f32) + poolb_ref[...]  # (1, H)
        # TODO(synk): pooler dropout (p=0.1) is identity in eval mode.
        logits = jnp.dot(pooled.astype(bf16), headw_ref[...],
                         preferred_element_type=f32) + headb_ref[...]  # (1, 2)
        out_ref[0] = logits.astype(out_ref.dtype)


def encoder_pool_head(hseq0, p, cfg):
    """Fused encoder (+final LN + pooler + head): grid=(batch, layer), weights streamed per layer."""
    B, S, H = hseq0.shape
    L, I, nh = cfg["layers"], cfg["inter"], cfg["heads"]
    Dh = H // nh

    per_l_vec = lambda n: pl.BlockSpec((1, 1, n), lambda b, l: (l, 0, 0))       # (L,1,n) params
    per_l_mat = lambda m, n: pl.BlockSpec((1, m, n), lambda b, l: (l, 0, 0))    # (L,m,n) weights
    resident = lambda shape: pl.BlockSpec(shape, lambda b, l: (0,) * len(shape))

    in_specs = [
        pl.BlockSpec((1, S, H), lambda b, l: (b, 0, 0)),                        # hseq0
        per_l_vec(H), per_l_vec(H),                                             # ln1 gamma / beta
        per_l_mat(H, 3 * H), per_l_vec(3 * H),                                  # wqkv, bqkv
        pl.BlockSpec((1, nh, Dh, H), lambda b, l: (l, 0, 0, 0)),                # wo (per-head rows)
        per_l_vec(H),                                                           # bo
        per_l_vec(H), per_l_vec(H),                                             # ln2 gamma / beta
        per_l_mat(H, I), per_l_vec(I),                                          # wi, bi
        per_l_mat(I, H), per_l_vec(H),                                          # wo2, bo2
        resident((1, H)), resident((1, H)),                                     # final LN gamma/beta
        resident((H, H)), resident((1, H)),                                     # pooler dense
        resident((H, 2)), resident((1, 2)),                                     # replaced head
    ]
    out = pl.pallas_call(
        functools.partial(_encoder_kernel, heads=nh, ln_eps=cfg["ln_eps"]),
        out_shape=jax.ShapeDtypeStruct((B, 1, 2), jnp.float32),
        grid=(B, L),
        in_specs=in_specs,
        out_specs=pl.BlockSpec((1, 1, 2), lambda b, l: (b, 0, 0)),
        scratch_shapes=[pltpu.VMEM((S, H), jnp.float32)],
        compiler_params=pltpu.CompilerParams(
            dimension_semantics=("parallel", "arbitrary")),   # batch parallel (v7x 2 TCs), layers carried
    )(hseq0,
      p["ln1_g"], p["ln1_b"], p["wqkv"], p["bqkv"], p["wo"], p["bo"],
      p["ln2_g"], p["ln2_b"], p["wi"], p["bi"], p["wo2"], p["bo2"],
      p["final_g"], p["final_b"], p["pool_w"], p["pool_b"],
      p["head_w"], p["head_b"])
    return out[:, 0, :]


# ----------------------------------------------------------------------- parameters
def init_params(key, cfg):
    f32, bf16 = jnp.float32, jnp.bfloat16
    keys = iter(jax.random.split(key, 64))

    def nrm(shape, scale=0.02, dtype=f32):
        return (scale * jax.random.normal(next(keys), shape, f32)).astype(dtype)

    H, C1, K, I, L = cfg["hidden"], cfg["c1"], cfg["conv_k"], cfg["inter"], cfg["layers"]
    nh = cfg["heads"]
    Dh = H // nh
    ph = cfg["patch_h"]
    nPh = cfg["eeg_h"] // ph
    out_w = (cfg["eeg_w"] + 2 * cfg["conv_pad"] - K) // K + 1
    S = nPh * out_w + 1

    p = {
        # conv1 weight stored as (K, C1) for the matmul formulation (torch: (C1,1,1,K))
        "conv1_w": nrm((K, C1)),
        # BatchNorm2d(C1) parameters + running stats (inference mode)
        "bn_gamma": 1.0 + nrm((C1,)),
        "bn_beta": nrm((C1,)),
        "bn_mean": nrm((C1,)),
        "bn_var": jax.random.uniform(next(keys), (C1,), f32, 0.5, 1.5),
        # grouped patch projection Conv2d(C1, H, (8,1), stride (8,1), groups=C1), bias=True
        "patch_w": nrm((H, ph)),     # torch weight (H, 1, 8, 1) squeezed
        "patch_b": nrm((H,)),
        "cls": nrm((1, 1, H)),
        "pos": nrm((1, S, H)),
        # stacked per-layer encoder weights: matmul weights bf16, LN params/biases f32
        "ln1_g": jnp.ones((L, 1, H), f32), "ln1_b": jnp.zeros((L, 1, H), f32),
        "wqkv": nrm((L, H, 3 * H), dtype=bf16), "bqkv": nrm((L, 1, 3 * H)),
        "wo": nrm((L, nh, Dh, H), dtype=bf16), "bo": nrm((L, 1, H)),
        "ln2_g": jnp.ones((L, 1, H), f32), "ln2_b": jnp.zeros((L, 1, H), f32),
        "wi": nrm((L, H, I), dtype=bf16), "bi": nrm((L, 1, I)),
        "wo2": nrm((L, I, H), dtype=bf16), "bo2": nrm((L, 1, H)),
        # final LN + pooler + replaced head
        "final_g": jnp.ones((1, H), f32), "final_b": jnp.zeros((1, H), f32),
        "pool_w": nrm((H, H), dtype=bf16), "pool_b": nrm((1, H)),
        "head_w": nrm((H, 2), dtype=bf16), "head_b": jnp.zeros((1, 2), f32),
    }
    return p


# ----------------------------------------------------------------------- forward pass
def eegvit_forward(x, p, cfg):
    B = x.shape[0]
    K, C1, H = cfg["conv_k"], cfg["c1"], cfg["hidden"]
    ph, pad = cfg["patch_h"], cfg["conv_pad"]

    # --- fold conv1 (kernel (1,K), stride (1,K), pad (0,2), no bias) + eval-mode BN (eps=0.0)
    #     + grouped patch conv (8,1)/groups=C1 into one dense (ph*K, H) weight + (H,) bias.
    #     W_eff[r*K+k, o] = patch_w[o,r] * a[g(o)] * conv1_w[k, g(o)],  g(o) = o // (H/C1)
    # TODO(synk): train-mode BatchNorm (batch statistics) not implemented; eval mode only.
    Gm = H // C1
    g_of_o = jnp.arange(H) // Gm
    a = p["bn_gamma"] / jnp.sqrt(p["bn_var"] + cfg["bn_eps"])
    b_bn = p["bn_beta"] - p["bn_mean"] * a
    cw = p["conv1_w"][:, g_of_o] * a[g_of_o][None, :]                    # (K, H)
    w_eff = (p["patch_w"].T[:, None, :] * cw[None, :, :]).reshape(ph * K, H)
    bias_eff = p["patch_b"] + b_bn[g_of_o] * jnp.sum(p["patch_w"], axis=1)

    # --- im2col over (ph, K) patches of the RAW input (no NHWC feature map materialized)
    xp = jnp.pad(x, ((0, 0), (0, 0), (0, 0), (pad, pad)))
    Wp = xp.shape[3]
    out_w = Wp // K
    nPh = xp.shape[2] // ph
    Pn = nPh * out_w
    rows = (xp[:, 0, :nPh * ph, :out_w * K]
            .reshape(B, nPh, ph, out_w, K)
            .transpose(0, 1, 3, 2, 4)
            .reshape(B * Pn, ph * K))

    tokens = embed_matmul(rows, w_eff.astype(jnp.bfloat16), bias_eff).reshape(B, Pn, H)

    # --- [CLS] + position embeddings (embedding dropout = identity in eval)
    cls = jnp.broadcast_to(p["cls"], (B, 1, H))
    hseq0 = jnp.concatenate([cls, tokens], axis=1) + p["pos"]            # (B, S, H)

    # --- fused encoder + final LN + pooler dense + Linear(H,2) head (== pooler_output)
    return encoder_pool_head(hseq0.astype(jnp.float32), p, cfg)          # (B, 2)


# ----------------------------------------------------------------------------- main
if __name__ == "__main__":
    cfg = CFG
    key = jax.random.PRNGKey(0)
    kx, kp = jax.random.split(key)
    x = jax.random.normal(kx, (cfg["batch"], 1, cfg["eeg_h"], cfg["eeg_w"]), jnp.float32)
    params = init_params(kp, cfg)

    fwd = jax.jit(functools.partial(eegvit_forward, cfg=cfg))
    y = fwd(x, params)
    jax.block_until_ready(y)
    assert y.shape == (cfg["batch"], 2), y.shape
    assert bool(jnp.all(jnp.isfinite(y)))
    print("KERNEL_OK")
</pallas_src>

<mosaic_0001>
module attributes {stable_mosaic.version = 11 : i64} {
  func.func @_matmul_bias_kernel(%arg0: i32, %arg1: memref<24x96xf32, #tpu.memory_space<vmem>>, %arg2: memref<96x32xbf16, #tpu.memory_space<vmem>>, %arg3: memref<1x32xf32, #tpu.memory_space<vmem>>, %arg4: memref<24x32xf32, #tpu.memory_space<vmem>>) attributes {dimension_semantics = [#tpu.dimension_semantics<arbitrary>], iteration_bounds = array<i64: 1>, scalar_prefetch = 0 : i64, scratch_operands = 0 : i64, tpu.core_type = #tpu.core_type<tc>, window_params = [{pipeline_mode = #tpu.pipeline_mode<synchronous>, transform_indices = @transform_0, window_bounds = array<i64: 24, 96>}, {pipeline_mode = #tpu.pipeline_mode<synchronous>, transform_indices = @transform_1, window_bounds = array<i64: 96, 32>}, {pipeline_mode = #tpu.pipeline_mode<synchronous>, transform_indices = @transform_2, window_bounds = array<i64: 1, 32>}, {pipeline_mode = #tpu.pipeline_mode<synchronous>, transform_indices = @transform_3, window_bounds = array<i64: 24, 32>}]} {
    %c0 = arith.constant 0 : index
    %c0_0 = arith.constant 0 : index
    %0 = vector.load %arg1[%c0, %c0_0] : memref<24x96xf32, #tpu.memory_space<vmem>>, vector<24x96xf32>
    %1 = arith.truncf %0 : vector<24x96xf32> to vector<24x96xbf16>
    %c0_1 = arith.constant 0 : index
    %c0_2 = arith.constant 0 : index
    %2 = vector.load %arg2[%c0_1, %c0_2] : memref<96x32xbf16, #tpu.memory_space<vmem>>, vector<96x32xbf16>
    %cst = arith.constant dense<0.000000e+00> : vector<24x32xf32>
    %3 = tpu.matmul %1, %2, %cst {dimension_numbers = #tpu.dot_dimension_numbers<[1], [0], [0], [1], [0, 0, 1, 1], [], []>} : vector<24x96xbf16>, vector<96x32xbf16>, vector<24x32xf32> -> vector<24x32xf32>
    %c0_3 = arith.constant 0 : index
    %c0_4 = arith.constant 0 : index
    %4 = vector.load %arg3[%c0_3, %c0_4] : memref<1x32xf32, #tpu.memory_space<vmem>>, vector<1x32xf32>
    %5 = vector.broadcast %4 : vector<1x32xf32> to vector<24x32xf32>
    %6 = arith.addf %3, %5 : vector<24x32xf32>
    %c0_5 = arith.constant 0 : index
    %c0_6 = arith.constant 0 : index
    %7 = vector.load %arg4[%c0_5, %c0_6] : memref<24x32xf32, #tpu.memory_space<vmem>>, vector<24x32xf32>
    tpu.vector_store %arg4[%c0_5, %c0_6], %6 {strides = array<i32>} : memref<24x32xf32, #tpu.memory_space<vmem>>, vector<24x32xf32>,
    return
  }
  func.func @transform_0(%arg0: i32) -> (i32, i32) {
    %c0_i32 = arith.constant 0 : i32
    %c0_i32_0 = arith.constant 0 : i32
    %c0_i32_1 = arith.constant 0 : i32
    return %c0_i32, %c0_i32_0 : i32, i32
  }
  func.func @transform_1(%arg0: i32) -> (i32, i32) {
    %c0_i32 = arith.constant 0 : i32
    %c0_i32_0 = arith.constant 0 : i32
    %c0_i32_1 = arith.constant 0 : i32
    return %c0_i32, %c0_i32_0 : i32, i32
  }
  func.func @transform_2(%arg0: i32) -> (i32, i32) {
    %c0_i32 = arith.constant 0 : i32
    %c0_i32_0 = arith.constant 0 : i32
    %c0_i32_1 = arith.constant 0 : i32
    return %c0_i32, %c0_i32_0 : i32, i32
  }
  func.func @transform_3(%arg0: i32) -> (i32, i32) {
    %c0_i32 = arith.constant 0 : i32
    %c0_i32_0 = arith.constant 0 : i32
    %c0_i32_1 = arith.constant 0 : i32
    return %c0_i32, %c0_i32_0 : i32, i32
  }
}

module attributes {stable_mosaic.version = 11 : i64} {
  func.func @_encoder_kernel(%arg0: i32, %arg1: i32, %arg2: memref<1x13x32xf32, #tpu.memory_space<vmem>>, %arg3: memref<1x1x32xf32, #tpu.memory_space<vmem>>, %arg4: memref<1x1x32xf32, #tpu.memory_space<vmem>>, %arg5: memref<1x32x96xbf16, #tpu.memory_space<vmem>>, %arg6: memref<1x1x96xf32, #tpu.memory_space<vmem>>, %arg7: memref<1x4x8x32xbf16, #tpu.memory_space<vmem>>, %arg8: memref<1x1x32xf32, #tpu.memory_space<vmem>>, %arg9: memref<1x1x32xf32, #tpu.memory_space<vmem>>, %arg10: memref<1x1x32xf32, #tpu.memory_space<vmem>>, %arg11: memref<1x32x64xbf16, #tpu.memory_space<vmem>>, %arg12: memref<1x1x64xf32, #tpu.memory_space<vmem>>, %arg13: memref<1x64x32xbf16, #tpu.memory_space<vmem>>, %arg14: memref<1x1x32xf32, #tpu.memory_space<vmem>>, %arg15: memref<1x32xf32, #tpu.memory_space<vmem>>, %arg16: memref<1x32xf32, #tpu.memory_space<vmem>>, %arg17: memref<32x32xbf16, #tpu.memory_space<vmem>>, %arg18: memref<1x32xf32, #tpu.memory_space<vmem>>, %arg19: memref<32x2xbf16, #tpu.memory_space<vmem>>, %arg20: memref<1x2xf32, #tpu.memory_space<vmem>>, %arg21: memref<1x1x2xf32, #tpu.memory_space<vmem>>, %arg22: memref<13x32xf32, #tpu.memory_space<vmem>>) attributes {dimension_semantics = [#tpu.dimension_semantics<parallel>, #tpu.dimension_semantics<arbitrary>], iteration_bounds = array<i64: 2, 2>, scalar_prefetch = 0 : i64, scratch_operands = 1 : i64, tpu.core_type = #tpu.core_type<tc>, window_params = [{transform_indices = @transform_0, window_bounds = array<i64: 1, 13, 32>}, {transform_indices = @transform_1, window_bounds = array<i64: 1, 1, 32>}, {transform_indices = @transform_2, window_bounds = array<i64: 1, 1, 32>}, {transform_indices = @transform_3, window_bounds = array<i64: 1, 32, 96>}, {transform_indices = @transform_4, window_bounds = array<i64: 1, 1, 96>}, {transform_indices = @transform_5, window_bounds = array<i64: 1, 4, 8, 32>}, {transform_indices = @transform_6, window_bounds = array<i64: 1, 1, 32>}, {transform_indices = @transform_7, window_bounds = array<i64: 1, 1, 32>}, {transform_indices = @transform_8, window_bounds = array<i64: 1, 1, 32>}, {transform_indices = @transform_9, window_bounds = array<i64: 1, 32, 64>}, {transform_indices = @transform_10, window_bounds = array<i64: 1, 1, 64>}, {transform_indices = @transform_11, window_bounds = array<i64: 1, 64, 32>}, {transform_indices = @transform_12, window_bounds = array<i64: 1, 1, 32>}, {pipeline_mode = #tpu.pipeline_mode<synchronous>, transform_indices = @transform_13, window_bounds = array<i64: 1, 32>}, {pipeline_mode = #tpu.pipeline_mode<synchronous>, transform_indices = @transform_14, window_bounds = array<i64: 1, 32>}, {pipeline_mode = #tpu.pipeline_mode<synchronous>, transform_indices = @transform_15, window_bounds = array<i64: 32, 32>}, {pipeline_mode = #tpu.pipeline_mode<synchronous>, transform_indices = @transform_16, window_bounds = array<i64: 1, 32>}, {pipeline_mode = #tpu.pipeline_mode<synchronous>, transform_indices = @transform_17, window_bounds = array<i64: 32, 2>}, {pipeline_mode = #tpu.pipeline_mode<synchronous>, transform_indices = @transform_18, window_bounds = array<i64: 1, 2>}, {transform_indices = @transform_19, window_bounds = array<i64: 1, 1, 2>}]} {
    %c0_i32 = arith.constant 0 : i32
    %0 = arith.cmpi eq, %arg1, %c0_i32 : i32
    %1 = arith.extui %0 : i1 to i32
    %c0_i32_0 = arith.constant 0 : i32
    %2 = arith.cmpi ne, %1, %c0_i32_0 : i32
    scf.if %2 {
      %c0_92 = arith.constant 0 : index
      %c0_93 = arith.constant 0 : index
      %c0_94 = arith.constant 0 : index
      %204 = vector.load %arg2[%c0_92, %c0_93, %c0_94] : memref<1x13x32xf32, #tpu.memory_space<vmem>>, vector<1x13x32xf32>
      %205 = vector.shape_cast %204 : vector<1x13x32xf32> to vector<13x32xf32>
      %c0_95 = arith.constant 0 : index
      %c0_96 = arith.constant 0 : index
      %206 = vector.load %arg22[%c0_95, %c0_96] : memref<13x32xf32, #tpu.memory_space<vmem>>, vector<13x32xf32>
      tpu.vector_store %arg22[%c0_95, %c0_96], %205 {strides = array<i32>} : memref<13x32xf32, #tpu.memory_space<vmem>>, vector<13x32xf32>,
    } else {
    }
    %c0 = arith.constant 0 : index
    %c0_1 = arith.constant 0 : index
    %3 = vector.load %arg22[%c0, %c0_1] : memref<13x32xf32, #tpu.memory_space<vmem>>, vector<13x32xf32>
    %c0_2 = arith.constant 0 : index
    %c0_3 = arith.constant 0 : index
    %c0_4 = arith.constant 0 : index
    %4 = vector.load %arg3[%c0_2, %c0_3, %c0_4] : memref<1x1x32xf32, #tpu.memory_space<vmem>>, vector<1x1x32xf32>
    %5 = vector.shape_cast %4 : vector<1x1x32xf32> to vector<1x32xf32>
    %c0_5 = arith.constant 0 : index
    %c0_6 = arith.constant 0 : index
    %c0_7 = arith.constant 0 : index
    %6 = vector.load %arg4[%c0_5, %c0_6, %c0_7] : memref<1x1x32xf32, #tpu.memory_space<vmem>>, vector<1x1x32xf32>
    %7 = vector.shape_cast %6 : vector<1x1x32xf32> to vector<1x32xf32>
    %cst = arith.constant dense<0.000000e+00> : vector<13xf32>
    %8 = vector.multi_reduction <add>, %3, %cst [1] : vector<13x32xf32> to vector<13xf32>
    %9 = vector.shape_cast %8 : vector<13xf32> to vector<13x1xf32>
    %cst_8 = arith.constant 3.200000e+01 : f32
    %10 = vector.broadcast %cst_8 : f32 to vector<13x1xf32>
    %11 = arith.divf %9, %10 : vector<13x1xf32>
    %12 = vector.broadcast %11 : vector<13x1xf32> to vector<13x32xf32>
    %13 = arith.subf %3, %12 : vector<13x32xf32>
    %14 = arith.mulf %13, %13 : vector<13x32xf32>
    %cst_9 = arith.constant dense<0.000000e+00> : vector<13xf32>
    %15 = vector.multi_reduction <add>, %14, %cst_9 [1] : vector<13x32xf32> to vector<13xf32>
    %16 = vector.shape_cast %15 : vector<13xf32> to vector<13x1xf32>
    %cst_10 = arith.constant 3.200000e+01 : f32
    %17 = vector.broadcast %cst_10 : f32 to vector<13x1xf32>
    %18 = arith.divf %16, %17 : vector<13x1xf32>
    %cst_11 = arith.constant 9.99999996E-13 : f32
    %19 = vector.broadcast %cst_11 : f32 to vector<13x1xf32>
    %20 = arith.addf %18, %19 : vector<13x1xf32>
    %21 = math.rsqrt %20 : vector<13x1xf32>
    %22 = vector.broadcast %21 : vector<13x1xf32> to vector<13x32xf32>
    %23 = arith.mulf %13, %22 : vector<13x32xf32>
    %24 = vector.broadcast %5 : vector<1x32xf32> to vector<13x32xf32>
    %25 = arith.mulf %23, %24 : vector<13x32xf32>
    %26 = vector.broadcast %7 : vector<1x32xf32> to vector<13x32xf32>
    %27 = arith.addf %25, %26 : vector<13x32xf32>
    %28 = arith.truncf %27 : vector<13x32xf32> to vector<13x32xbf16>
    %c0_12 = arith.constant 0 : index
    %c0_13 = arith.constant 0 : index
    %c0_14 = arith.constant 0 : index
    %29 = vector.load %arg5[%c0_12, %c0_13, %c0_14] : memref<1x32x96xbf16, #tpu.memory_space<vmem>>, vector<1x32x96xbf16>
    %30 = vector.shape_cast %29 : vector<1x32x96xbf16> to vector<32x96xbf16>
    %cst_15 = arith.constant dense<0.000000e+00> : vector<13x96xf32>
    %31 = tpu.matmul %28, %30, %cst_15 {dimension_numbers = #tpu.dot_dimension_numbers<[1], [0], [0], [1], [0, 0, 1, 1], [], []>} : vector<13x32xbf16>, vector<32x96xbf16>, vector<13x96xf32> -> vector<13x96xf32>
    %c0_16 = arith.constant 0 : index
    %c0_17 = arith.constant 0 : index
    %c0_18 = arith.constant 0 : index
    %32 = vector.load %arg6[%c0_16, %c0_17, %c0_18] : memref<1x1x96xf32, #tpu.memory_space<vmem>>, vector<1x1x96xf32>
    %33 = vector.shape_cast %32 : vector<1x1x96xf32> to vector<1x96xf32>
    %34 = vector.broadcast %33 : vector<1x96xf32> to vector<13x96xf32>
    %35 = arith.addf %31, %34 : vector<13x96xf32>
    %cst_19 = arith.constant 0.000000e+00 : f32
    %36 = vector.broadcast %cst_19 : f32 to vector<13x32xf32>
    %37 = vector.extract_strided_slice %35 {offsets = [0, 0], sizes = [13, 8], strides = [1, 1]} : vector<13x96xf32> to vector<13x8xf32>
    %38 = arith.truncf %37 : vector<13x8xf32> to vector<13x8xbf16>
    %39 = vector.extract_strided_slice %35 {offsets = [0, 32], sizes = [13, 8], strides = [1, 1]} : vector<13x96xf32> to vector<13x8xf32>
    %40 = arith.truncf %39 : vector<13x8xf32> to vector<13x8xbf16>
    %41 = vector.extract_strided_slice %35 {offsets = [0, 64], sizes = [13, 8], strides = [1, 1]} : vector<13x96xf32> to vector<13x8xf32>
    %42 = arith.truncf %41 : vector<13x8xf32> to vector<13x8xbf16>
    %cst_20 = arith.constant dense<0.000000e+00> : vector<13x13xf32>
    %43 = tpu.matmul %38, %40, %cst_20 {dimension_numbers = #tpu.dot_dimension_numbers<[1], [1], [0], [0], [0, 0, 1, 0], [], []>} : vector<13x8xbf16>, vector<13x8xbf16>, vector<13x13xf32> -> vector<13x13xf32>
    %cst_21 = arith.constant 0.353553385 : f32
    %44 = vector.broadcast %cst_21 : f32 to vector<13x13xf32>
    %45 = arith.mulf %43, %44 : vector<13x13xf32>
    %cst_22 = arith.constant dense<0xFF800000> : vector<13xf32>
    %46 = vector.multi_reduction <maximumf>, %45, %cst_22 [1] : vector<13x13xf32> to vector<13xf32>
    %47 = vector.shape_cast %46 : vector<13xf32> to vector<13x1xf32>
    %48 = vector.broadcast %47 : vector<13x1xf32> to vector<13x13xf32>
    %49 = arith.subf %45, %48 : vector<13x13xf32>
    %50 = math.exp %49 : vector<13x13xf32>
    %cst_23 = arith.constant dense<0.000000e+00> : vector<13xf32>
    %51 = vector.multi_reduction <add>, %50, %cst_23 [1] : vector<13x13xf32> to vector<13xf32>
    %52 = vector.shape_cast %51 : vector<13xf32> to vector<13x1xf32>
    %53 = tpu.reciprocal %52 {approx = true} : vector<13x1xf32> -> vector<13x1xf32>
    %54 = vector.broadcast %53 : vector<13x1xf32> to vector<13x13xf32>
    %55 = arith.mulf %50, %54 : vector<13x13xf32>
    %56 = arith.truncf %55 : vector<13x13xf32> to vector<13x13xbf16>
    %cst_24 = arith.constant dense<0.000000e+00> : vector<13x8xf32>
    %57 = tpu.matmul %56, %42, %cst_24 {dimension_numbers = #tpu.dot_dimension_numbers<[1], [0], [0], [1], [0, 0, 1, 1], [], []>} : vector<13x13xbf16>, vector<13x8xbf16>, vector<13x8xf32> -> vector<13x8xf32>
    %58 = arith.truncf %57 : vector<13x8xf32> to vector<13x8xbf16>
    %c0_25 = arith.constant 0 : index
    %c0_26 = arith.constant 0 : index
    %c0_27 = arith.constant 0 : index
    %c0_28 = arith.constant 0 : index
    %59 = vector.load %arg7[%c0_25, %c0_26, %c0_27, %c0_28] : memref<1x4x8x32xbf16, #tpu.memory_space<vmem>>, vector<1x1x8x32xbf16>
    %60 = vector.shape_cast %59 : vector<1x1x8x32xbf16> to vector<8x32xbf16>
    %cst_29 = arith.constant dense<0.000000e+00> : vector<13x32xf32>
    %61 = tpu.matmul %58, %60, %cst_29 {dimension_numbers = #tpu.dot_dimension_numbers<[1], [0], [0], [1], [0, 0, 1, 1], [], []>} : vector<13x8xbf16>, vector<8x32xbf16>, vector<13x32xf32> -> vector<13x32xf32>
    %62 = arith.addf %36, %61 : vector<13x32xf32>
    %63 = vector.extract_strided_slice %35 {offsets = [0, 8], sizes = [13, 8], strides = [1, 1]} : vector<13x96xf32> to vector<13x8xf32>
    %64 = arith.truncf %63 : vector<13x8xf32> to vector<13x8xbf16>
    %65 = vector.extract_strided_slice %35 {offsets = [0, 40], sizes = [13, 8], strides = [1, 1]} : vector<13x96xf32> to vector<13x8xf32>
    %66 = arith.truncf %65 : vector<13x8xf32> to vector<13x8xbf16>
    %67 = vector.extract_strided_slice %35 {offsets = [0, 72], sizes = [13, 8], strides = [1, 1]} : vector<13x96xf32> to vector<13x8xf32>
    %68 = arith.truncf %67 : vector<13x8xf32> to vector<13x8xbf16>
    %cst_30 = arith.constant dense<0.000000e+00> : vector<13x13xf32>
    %69 = tpu.matmul %64, %66, %cst_30 {dimension_numbers = #tpu.dot_dimension_numbers<[1], [1], [0], [0], [0, 0, 1, 0], [], []>} : vector<13x8xbf16>, vector<13x8xbf16>, vector<13x13xf32> -> vector<13x13xf32>
    %cst_31 = arith.constant 0.353553385 : f32
    %70 = vector.broadcast %cst_31 : f32 to vector<13x13xf32>
    %71 = arith.mulf %69, %70 : vector<13x13xf32>
    %cst_32 = arith.constant dense<0xFF800000> : vector<13xf32>
    %72 = vector.multi_reduction <maximumf>, %71, %cst_32 [1] : vector<13x13xf32> to vector<13xf32>
    %73 = vector.shape_cast %72 : vector<13xf32> to vector<13x1xf32>
    %74 = vector.broadcast %73 : vector<13x1xf32> to vector<13x13xf32>
    %75 = arith.subf %71, %74 : vector<13x13xf32>
    %76 = math.exp %75 : vector<13x13xf32>
    %cst_33 = arith.constant dense<0.000000e+00> : vector<13xf32>
    %77 = vector.multi_reduction <add>, %76, %cst_33 [1] : vector<13x13xf32> to vector<13xf32>
    %78 = vector.shape_cast %77 : vector<13xf32> to vector<13x1xf32>
    %79 = tpu.reciprocal %78 {approx = true} : vector<13x1xf32> -> vector<13x1xf32>
    %80 = vector.broadcast %79 : vector<13x1xf32> to vector<13x13xf32>
    %81 = arith.mulf %76, %80 : vector<13x13xf32>
    %82 = arith.truncf %81 : vector<13x13xf32> to vector<13x13xbf16>
    %cst_34 = arith.constant dense<0.000000e+00> : vector<13x8xf32>
    %83 = tpu.matmul %82, %68, %cst_34 {dimension_numbers = #tpu.dot_dimension_numbers<[1], [0], [0], [1], [0, 0, 1, 1], [], []>} : vector<13x13xbf16>, vector<13x8xbf16>, vector<13x8xf32> -> vector<13x8xf32>
    %84 = arith.truncf %83 : vector<13x8xf32> to vector<13x8xbf16>
    %c0_35 = arith.constant 0 : index
    %c1 = arith.constant 1 : index
    %c0_36 = arith.constant 0 : index
    %c0_37 = arith.constant 0 : index
    %85 = vector.load %arg7[%c0_35, %c1, %c0_36, %c0_37] : memref<1x4x8x32xbf16, #tpu.memory_space<vmem>>, vector<1x1x8x32xbf16>
    %86 = vector.shape_cast %85 : vector<1x1x8x32xbf16> to vector<8x32xbf16>
    %cst_38 = arith.constant dense<0.000000e+00> : vector<13x32xf32>
    %87 = tpu.matmul %84, %86, %cst_38 {dimension_numbers = #tpu.dot_dimension_numbers<[1], [0], [0], [1], [0, 0, 1, 1], [], []>} : vector<13x8xbf16>, vector<8x32xbf16>, vector<13x32xf32> -> vector<13x32xf32>
    %88 = arith.addf %62, %87 : vector<13x32xf32>
    %89 = vector.extract_strided_slice %35 {offsets = [0, 16], sizes = [13, 8], strides = [1, 1]} : vector<13x96xf32> to vector<13x8xf32>
    %90 = arith.truncf %89 : vector<13x8xf32> to vector<13x8xbf16>
    %91 = vector.extract_strided_slice %35 {offsets = [0, 48], sizes = [13, 8], strides = [1, 1]} : vector<13x96xf32> to vector<13x8xf32>
    %92 = arith.truncf %91 : vector<13x8xf32> to vector<13x8xbf16>
    %93 = vector.extract_strided_slice %35 {offsets = [0, 80], sizes = [13, 8], strides = [1, 1]} : vector<13x96xf32> to vector<13x8xf32>
    %94 = arith.truncf %93 : vector<13x8xf32> to vector<13x8xbf16>
    %cst_39 = arith.constant dense<0.000000e+00> : vector<13x13xf32>
    %95 = tpu.matmul %90, %92, %cst_39 {dimension_numbers = #tpu.dot_dimension_numbers<[1], [1], [0], [0], [0, 0, 1, 0], [], []>} : vector<13x8xbf16>, vector<13x8xbf16>, vector<13x13xf32> -> vector<13x13xf32>
    %cst_40 = arith.constant 0.353553385 : f32
    %96 = vector.broadcast %cst_40 : f32 to vector<13x13xf32>
    %97 = arith.mulf %95, %96 : vector<13x13xf32>
    %cst_41 = arith.constant dense<0xFF800000> : vector<13xf32>
    %98 = vector.multi_reduction <maximumf>, %97, %cst_41 [1] : vector<13x13xf32> to vector<13xf32>
    %99 = vector.shape_cast %98 : vector<13xf32> to vector<13x1xf32>
    %100 = vector.broadcast %99 : vector<13x1xf32> to vector<13x13xf32>
    %101 = arith.subf %97, %100 : vector<13x13xf32>
    %102 = math.exp %101 : vector<13x13xf32>
    %cst_42 = arith.constant dense<0.000000e+00> : vector<13xf32>
    %103 = vector.multi_reduction <add>, %102, %cst_42 [1] : vector<13x13xf32> to vector<13xf32>
    %104 = vector.shape_cast %103 : vector<13xf32> to vector<13x1xf32>
    %105 = tpu.reciprocal %104 {approx = true} : vector<13x1xf32> -> vector<13x1xf32>
    %106 = vector.broadcast %105 : vector<13x1xf32> to vector<13x13xf32>
    %107 = arith.mulf %102, %106 : vector<13x13xf32>
    %108 = arith.truncf %107 : vector<13x13xf32> to vector<13x13xbf16>
    %cst_43 = arith.constant dense<0.000000e+00> : vector<13x8xf32>
    %109 = tpu.matmul %108, %94, %cst_43 {dimension_numbers = #tpu.dot_dimension_numbers<[1], [0], [0], [1], [0, 0, 1, 1], [], []>} : vector<13x13xbf16>, vector<13x8xbf16>, vector<13x8xf32> -> vector<13x8xf32>
    %110 = arith.truncf %109 : vector<13x8xf32> to vector<13x8xbf16>
    %c0_44 = arith.constant 0 : index
    %c2 = arith.constant 2 : index
    %c0_45 = arith.constant 0 : index
    %c0_46 = arith.constant 0 : index
    %111 = vector.load %arg7[%c0_44, %c2, %c0_45, %c0_46] : memref<1x4x8x32xbf16, #tpu.memory_space<vmem>>, vector<1x1x8x32xbf16>
    %112 = vector.shape_cast %111 : vector<1x1x8x32xbf16> to vector<8x32xbf16>
    %cst_47 = arith.constant dense<0.000000e+00> : vector<13x32xf32>
    %113 = tpu.matmul %110, %112, %cst_47 {dimension_numbers = #tpu.dot_dimension_numbers<[1], [0], [0], [1], [0, 0, 1, 1], [], []>} : vector<13x8xbf16>, vector<8x32xbf16>, vector<13x32xf32> -> vector<13x32xf32>
    %114 = arith.addf %88, %113 : vector<13x32xf32>
    %115 = vector.extract_strided_slice %35 {offsets = [0, 24], sizes = [13, 8], strides = [1, 1]} : vector<13x96xf32> to vector<13x8xf32>
    %116 = arith.truncf %115 : vector<13x8xf32> to vector<13x8xbf16>
    %117 = vector.extract_strided_slice %35 {offsets = [0, 56], sizes = [13, 8], strides = [1, 1]} : vector<13x96xf32> to vector<13x8xf32>
    %118 = arith.truncf %117 : vector<13x8xf32> to vector<13x8xbf16>
    %119 = vector.extract_strided_slice %35 {offsets = [0, 88], sizes = [13, 8], strides = [1, 1]} : vector<13x96xf32> to vector<13x8xf32>
    %120 = arith.truncf %119 : vector<13x8xf32> to vector<13x8xbf16>
    %cst_48 = arith.constant dense<0.000000e+00> : vector<13x13xf32>
    %121 = tpu.matmul %116, %118, %cst_48 {dimension_numbers = #tpu.dot_dimension_numbers<[1], [1], [0], [0], [0, 0, 1, 0], [], []>} : vector<13x8xbf16>, vector<13x8xbf16>, vector<13x13xf32> -> vector<13x13xf32>
    %cst_49 = arith.constant 0.353553385 : f32
    %122 = vector.broadcast %cst_49 : f32 to vector<13x13xf32>
    %123 = arith.mulf %121, %122 : vector<13x13xf32>
    %cst_50 = arith.constant dense<0xFF800000> : vector<13xf32>
    %124 = vector.multi_reduction <maximumf>, %123, %cst_50 [1] : vector<13x13xf32> to vector<13xf32>
    %125 = vector.shape_cast %124 : vector<13xf32> to vector<13x1xf32>
    %126 = vector.broadcast %125 : vector<13x1xf32> to vector<13x13xf32>
    %127 = arith.subf %123, %126 : vector<13x13xf32>
    %128 = math.exp %127 : vector<13x13xf32>
    %cst_51 = arith.constant dense<0.000000e+00> : vector<13xf32>
    %129 = vector.multi_reduction <add>, %128, %cst_51 [1] : vector<13x13xf32> to vector<13xf32>
    %130 = vector.shape_cast %129 : vector<13xf32> to vector<13x1xf32>
    %131 = tpu.reciprocal %130 {approx = true} : vector<13x1xf32> -> vector<13x1xf32>
    %132 = vector.broadcast %131 : vector<13x1xf32> to vector<13x13xf32>
    %133 = arith.mulf %128, %132 : vector<13x13xf32>
    %134 = arith.truncf %133 : vector<13x13xf32> to vector<13x13xbf16>
    %cst_52 = arith.constant dense<0.000000e+00> : vector<13x8xf32>
    %135 = tpu.matmul %134, %120, %cst_52 {dimension_numbers = #tpu.dot_dimension_numbers<[1], [0], [0], [1], [0, 0, 1, 1], [], []>} : vector<13x13xbf16>, vector<13x8xbf16>, vector<13x8xf32> -> vector<13x8xf32>
    %136 = arith.truncf %135 : vector<13x8xf32> to vector<13x8xbf16>
    %c0_53 = arith.constant 0 : index
    %c3 = arith.constant 3 : index
    %c0_54 = arith.constant 0 : index
    %c0_55 = arith.constant 0 : index
    %137 = vector.load %arg7[%c0_53, %c3, %c0_54, %c0_55] : memref<1x4x8x32xbf16, #tpu.memory_space<vmem>>, vector<1x1x8x32xbf16>
    %138 = vector.shape_cast %137 : vector<1x1x8x32xbf16> to vector<8x32xbf16>
    %cst_56 = arith.constant dense<0.000000e+00> : vector<13x32xf32>
    %139 = tpu.matmul %136, %138, %cst_56 {dimension_numbers = #tpu.dot_dimension_numbers<[1], [0], [0], [1], [0, 0, 1, 1], [], []>} : vector<13x8xbf16>, vector<8x32xbf16>, vector<13x32xf32> -> vector<13x32xf32>
    %140 = arith.addf %114, %139 : vector<13x32xf32>
    %141 = arith.addf %3, %140 : vector<13x32xf32>
    %c0_57 = arith.constant 0 : index
    %c0_58 = arith.constant 0 : index
    %c0_59 = arith.constant 0 : index
    %142 = vector.load %arg8[%c0_57, %c0_58, %c0_59] : memref<1x1x32xf32, #tpu.memory_space<vmem>>, vector<1x1x32xf32>
    %143 = vector.shape_cast %142 : vector<1x1x32xf32> to vector<1x32xf32>
    %144 = vector.broadcast %143 : vector<1x32xf32> to vector<13x32xf32>
    %145 = arith.addf %141, %144 : vector<13x32xf32>
    %c0_60 = arith.constant 0 : index
    %c0_61 = arith.constant 0 : index
    %c0_62 = arith.constant 0 : index
    %146 = vector.load %arg9[%c0_60, %c0_61, %c0_62] : memref<1x1x32xf32, #tpu.memory_space<vmem>>, vector<1x1x32xf32>
    %147 = vector.shape_cast %146 : vector<1x1x32xf32> to vector<1x32xf32>
    %c0_63 = arith.constant 0 : index
    %c0_64 = arith.constant 0 : index
    %c0_65 = arith.constant 0 : index
    %148 = vector.load %arg10[%c0_63, %c0_64, %c0_65] : memref<1x1x32xf32, #tpu.memory_space<vmem>>, vector<1x1x32xf32>
    %149 = vector.shape_cast %148 : vector<1x1x32xf32> to vector<1x32xf32>
    %cst_66 = arith.constant dense<0.000000e+00> : vector<13xf32>
    %150 = vector.multi_reduction <add>, %145, %cst_66 [1] : vector<13x32xf32> to vector<13xf32>
    %151 = vector.shape_cast %150 : vector<13xf32> to vector<13x1xf32>
    %cst_67 = arith.constant 3.200000e+01 : f32
    %152 = vector.broadcast %cst_67 : f32 to vector<13x1xf32>
    %153 = arith.divf %151, %152 : vector<13x1xf32>
    %154 = vector.broadcast %153 : vector<13x1xf32> to vector<13x32xf32>
    %155 = arith.subf %145, %154 : vector<13x32xf32>
    %156 = arith.mulf %155, %155 : vector<13x32xf32>
    %cst_68 = arith.constant dense<0.000000e+00> : vector<13xf32>
    %157 = vector.multi_reduction <add>, %156, %cst_68 [1] : vector<13x32xf32> to vector<13xf32>
    %158 = vector.shape_cast %157 : vector<13xf32> to vector<13x1xf32>
    %cst_69 = arith.constant 3.200000e+01 : f32
    %159 = vector.broadcast %cst_69 : f32 to vector<13x1xf32>
    %160 = arith.divf %158, %159 : vector<13x1xf32>
    %cst_70 = arith.constant 9.99999996E-13 : f32
    %161 = vector.broadcast %cst_70 : f32 to vector<13x1xf32>
    %162 = arith.addf %160, %161 : vector<13x1xf32>
    %163 = math.rsqrt %162 : vector<13x1xf32>
    %164 = vector.broadcast %163 : vector<13x1xf32> to vector<13x32xf32>
    %165 = arith.mulf %155, %164 : vector<13x32xf32>
    %166 = vector.broadcast %147 : vector<1x32xf32> to vector<13x32xf32>
    %167 = arith.mulf %165, %166 : vector<13x32xf32>
    %168 = vector.broadcast %149 : vector<1x32xf32> to vector<13x32xf32>
    %169 = arith.addf %167, %168 : vector<13x32xf32>
    %170 = arith.truncf %169 : vector<13x32xf32> to vector<13x32xbf16>
    %c0_71 = arith.constant 0 : index
    %c0_72 = arith.constant 0 : index
    %c0_73 = arith.constant 0 : index
    %171 = vector.load %arg11[%c0_71, %c0_72, %c0_73] : memref<1x32x64xbf16, #tpu.memory_space<vmem>>, vector<1x32x64xbf16>
    %172 = vector.shape_cast %171 : vector<1x32x64xbf16> to vector<32x64xbf16>
    %cst_74 = arith.constant dense<0.000000e+00> : vector<13x64xf32>
    %173 = tpu.matmul %170, %172, %cst_74 {dimension_numbers = #tpu.dot_dimension_numbers<[1], [0], [0], [1], [0, 0, 1, 1], [], []>} : vector<13x32xbf16>, vector<32x64xbf16>, vector<13x64xf32> -> vector<13x64xf32>
    %c0_75 = arith.constant 0 : index
    %c0_76 = arith.constant 0 : index
    %c0_77 = arith.constant 0 : index
    %174 = vector.load %arg12[%c0_75, %c0_76, %c0_77] : memref<1x1x64xf32, #tpu.memory_space<vmem>>, vector<1x1x64xf32>
    %175 = vector.shape_cast %174 : vector<1x1x64xf32> to vector<1x64xf32>
    %176 = vector.broadcast %175 : vector<1x64xf32> to vector<13x64xf32>
    %177 = arith.addf %173, %176 : vector<13x64xf32>
    %cst_78 = arith.constant 5.000000e-01 : f32
    %178 = vector.broadcast %cst_78 : f32 to vector<13x64xf32>
    %179 = arith.mulf %178, %177 : vector<13x64xf32>
    %cst_79 = arith.constant 4.471500e-02 : f32
    %180 = vector.broadcast %cst_79 : f32 to vector<13x64xf32>
    %181 = arith.mulf %180, %177 : vector<13x64xf32>
    %182 = arith.mulf %181, %177 : vector<13x64xf32>
    %183 = arith.mulf %182, %177 : vector<13x64xf32>
    %184 = arith.addf %177, %183 : vector<13x64xf32>
    %cst_80 = arith.constant 0.797884583 : f32
    %185 = vector.broadcast %cst_80 : f32 to vector<13x64xf32>
    %186 = arith.mulf %185, %184 : vector<13x64xf32>
    %187 = math.tanh %186 : vector<13x64xf32>
    %cst_81 = arith.constant 1.000000e+00 : f32
    %188 = vector.broadcast %cst_81 : f32 to vector<13x64xf32>
    %189 = arith.addf %188, %187 : vector<13x64xf32>
    %190 = arith.mulf %179, %189 : vector<13x64xf32>
    %191 = arith.truncf %190 : vector<13x64xf32> to vector<13x64xbf16>
    %c0_82 = arith.constant 0 : index
    %c0_83 = arith.constant 0 : index
    %c0_84 = arith.constant 0 : index
    %192 = vector.load %arg13[%c0_82, %c0_83, %c0_84] : memref<1x64x32xbf16, #tpu.memory_space<vmem>>, vector<1x64x32xbf16>
    %193 = vector.shape_cast %192 : vector<1x64x32xbf16> to vector<64x32xbf16>
    %cst_85 = arith.constant dense<0.000000e+00> : vector<13x32xf32>
    %194 = tpu.matmul %191, %193, %cst_85 {dimension_numbers = #tpu.dot_dimension_numbers<[1], [0], [0], [1], [0, 0, 1, 1], [], []>} : vector<13x64xbf16>, vector<64x32xbf16>, vector<13x32xf32> -> vector<13x32xf32>
    %c0_86 = arith.constant 0 : index
    %c0_87 = arith.constant 0 : index
    %c0_88 = arith.constant 0 : index
    %195 = vector.load %arg14[%c0_86, %c0_87, %c0_88] : memref<1x1x32xf32, #tpu.memory_space<vmem>>, vector<1x1x32xf32>
    %196 = vector.shape_cast %195 : vector<1x1x32xf32> to vector<1x32xf32>
    %197 = vector.broadcast %196 : vector<1x32xf32> to vector<13x32xf32>
    %198 = arith.addf %194, %197 : vector<13x32xf32>
    %199 = arith.addf %145, %198 : vector<13x32xf32>
    %c0_89 = arith.constant 0 : index
    %c0_90 = arith.constant 0 : index
    %200 = vector.load %arg22[%c0_89, %c0_90] : memref<13x32xf32, #tpu.memory_space<vmem>>, vector<13x32xf32>
    tpu.vector_store %arg22[%c0_89, %c0_90], %199 {strides = array<i32>} : memref<13x32xf32, #tpu.memory_space<vmem>>, vector<13x32xf32>,
    %c1_i32 = arith.constant 1 : i32
    %201 = arith.cmpi eq, %arg1, %c1_i32 : i32
    %202 = arith.extui %201 : i1 to i32
    %c0_i32_91 = arith.constant 0 : i32
    %203 = arith.cmpi ne, %202, %c0_i32_91 : i32
    scf.if %203 {
      %204 = vector.extract_strided_slice %199 {offsets = [0, 0], sizes = [1, 32], strides = [1, 1]} : vector<13x32xf32> to vector<1x32xf32>
      %c0_92 = arith.constant 0 : index
      %c0_93 = arith.constant 0 : index
      %205 = vector.load %arg15[%c0_92, %c0_93] : memref<1x32xf32, #tpu.memory_space<vmem>>, vector<1x32xf32>
      %c0_94 = arith.constant 0 : index
      %c0_95 = arith.constant 0 : index
      %206 = vector.load %arg16[%c0_94, %c0_95] : memref<1x32xf32, #tpu.memory_space<vmem>>, vector<1x32xf32>
      %cst_96 = arith.constant dense<0.000000e+00> : vector<1xf32>
      %207 = vector.multi_reduction <add>, %204, %cst_96 [1] : vector<1x32xf32> to vector<1xf32>
      %208 = vector.shape_cast %207 : vector<1xf32> to vector<1x1xf32>
      %cst_97 = arith.constant 3.200000e+01 : f32
      %209 = vector.broadcast %cst_97 : f32 to vector<1x1xf32>
      %210 = arith.divf %208, %209 : vector<1x1xf32>
      %211 = vector.broadcast %210 : vector<1x1xf32> to vector<1x32xf32>
      %212 = arith.subf %204, %211 : vector<1x32xf32>
      %213 = arith.mulf %212, %212 : vector<1x32xf32>
      %cst_98 = arith.constant dense<0.000000e+00> : vector<1xf32>
      %214 = vector.multi_reduction <add>, %213, %cst_98 [1] : vector<1x32xf32> to vector<1xf32>
      %215 = vector.shape_cast %214 : vector<1xf32> to vector<1x1xf32>
      %cst_99 = arith.constant 3.200000e+01 : f32
      %216 = vector.broadcast %cst_99 : f32 to vector<1x1xf32>
      %217 = arith.divf %215, %216 : vector<1x1xf32>
      %cst_100 = arith.constant 9.99999996E-13 : f32
      %218 = vector.broadcast %cst_100 : f32 to vector<1x1xf32>
      %219 = arith.addf %217, %218 : vector<1x1xf32>
      %220 = math.rsqrt %219 : vector<1x1xf32>
      %221 = vector.broadcast %220 : vector<1x1xf32> to vector<1x32xf32>
      %222 = arith.mulf %212, %221 : vector<1x32xf32>
      %223 = arith.mulf %222, %205 : vector<1x32xf32>
      %224 = arith.addf %223, %206 : vector<1x32xf32>
      %225 = arith.truncf %224 : vector<1x32xf32> to vector<1x32xbf16>
      %c0_101 = arith.constant 0 : index
      %c0_102 = arith.constant 0 : index
      %226 = vector.load %arg17[%c0_101, %c0_102] : memref<32x32xbf16, #tpu.memory_space<vmem>>, vector<32x32xbf16>
      %cst_103 = arith.constant dense<0.000000e+00> : vector<1x32xf32>
      %227 = tpu.matmul %225, %226, %cst_103 {dimension_numbers = #tpu.dot_dimension_numbers<[1], [0], [0], [1], [0, 0, 1, 1], [], []>} : vector<1x32xbf16>, vector<32x32xbf16>, vector<1x32xf32> -> vector<1x32xf32>
      %c0_104 = arith.constant 0 : index
      %c0_105 = arith.constant 0 : index
      %228 = vector.load %arg18[%c0_104, %c0_105] : memref<1x32xf32, #tpu.memory_space<vmem>>, vector<1x32xf32>
      %229 = arith.addf %227, %228 : vector<1x32xf32>
      %230 = arith.truncf %229 : vector<1x32xf32> to vector<1x32xbf16>
      %c0_106 = arith.constant 0 : index
      %c0_107 = arith.constant 0 : index
      %231 = vector.load %arg19[%c0_106, %c0_107] : memref<32x2xbf16, #tpu.memory_space<vmem>>, vector<32x2xbf16>
      %cst_108 = arith.constant dense<0.000000e+00> : vector<1x2xf32>
      %232 = tpu.matmul %230, %231, %cst_108 {dimension_numbers = #tpu.dot_dimension_numbers<[1], [0], [0], [1], [0, 0, 1, 1], [], []>} : vector<1x32xbf16>, vector<32x2xbf16>, vector<1x2xf32> -> vector<1x2xf32>
      %c0_109 = arith.constant 0 : index
      %c0_110 = arith.constant 0 : index
      %233 = vector.load %arg20[%c0_109, %c0_110] : memref<1x2xf32, #tpu.memory_space<vmem>>, vector<1x2xf32>
      %234 = arith.addf %232, %233 : vector<1x2xf32>
      %c0_111 = arith.constant 0 : index
      %c0_112 = arith.constant 0 : index
      %c0_113 = arith.constant 0 : index
      %235 = vector.load %arg21[%c0_111, %c0_112, %c0_113] : memref<1x1x2xf32, #tpu.memory_space<vmem>>, vector<1x1x2xf32>
      %236 = vector.shape_cast %235 : vector<1x1x2xf32> to vector<1x2xf32>
      %237 = vector.shape_cast %234 : vector<1x2xf32> to vector<1x1x2xf32>
      tpu.vector_store %arg21[%c0_111, %c0_112, %c0_113], %237 {strides = array<i32>} : memref<1x1x2xf32, #tpu.memory_space<vmem>>, vector<1x1x2xf32>,
    } else {
    }
    return
  }
  func.func @transform_0(%arg0: i32, %arg1: i32) -> (i32, i32, i32) {
    %c0_i32 = arith.constant 0 : i32
    %c0_i32_0 = arith.constant 0 : i32
    %c0_i32_1 = arith.constant 0 : i32
    return %arg0, %c0_i32, %c0_i32_0 : i32, i32, i32
  }
  func.func @transform_1(%arg0: i32, %arg1: i32) -> (i32, i32, i32) {
    %c0_i32 = arith.constant 0 : i32
    %c0_i32_0 = arith.constant 0 : i32
    %c0_i32_1 = arith.constant 0 : i32
    return %arg1, %c0_i32, %c0_i32_0 : i32, i32, i32
  }
  func.func @transform_2(%arg0: i32, %arg1: i32) -> (i32, i32, i32) {
    %c0_i32 = arith.constant 0 : i32
    %c0_i32_0 = arith.constant 0 : i32
    %c0_i32_1 = arith.constant 0 : i32
    return %arg1, %c0_i32, %c0_i32_0 : i32, i32, i32
  }
  func.func @transform_3(%arg0: i32, %arg1: i32) -> (i32, i32, i32) {
    %c0_i32 = arith.constant 0 : i32
    %c0_i32_0 = arith.constant 0 : i32
    %c0_i32_1 = arith.constant 0 : i32
    return %arg1, %c0_i32, %c0_i32_0 : i32, i32, i32
  }
  func.func @transform_4(%arg0: i32, %arg1: i32) -> (i32, i32, i32) {
    %c0_i32 = arith.constant 0 : i32
    %c0_i32_0 = arith.constant 0 : i32
    %c0_i32_1 = arith.constant 0 : i32
    return %arg1, %c0_i32, %c0_i32_0 : i32, i32, i32
  }
  func.func @transform_5(%arg0: i32, %arg1: i32) -> (i32, i32, i32, i32) {
    %c0_i32 = arith.constant 0 : i32
    %c0_i32_0 = arith.constant 0 : i32
    %c0_i32_1 = arith.constant 0 : i32
    %c0_i32_2 = arith.constant 0 : i32
    return %arg1, %c0_i32, %c0_i32_0, %c0_i32_1 : i32, i32, i32, i32
  }
  func.func @transform_6(%arg0: i32, %arg1: i32) -> (i32, i32, i32) {
    %c0_i32 = arith.constant 0 : i32
    %c0_i32_0 = arith.constant 0 : i32
    %c0_i32_1 = arith.constant 0 : i32
    return %arg1, %c0_i32, %c0_i32_0 : i32, i32, i32
  }
  func.func @transform_7(%arg0: i32, %arg1: i32) -> (i32, i32, i32) {
    %c0_i32 = arith.constant 0 : i32
    %c0_i32_0 = arith.constant 0 : i32
    %c0_i32_1 = arith.constant 0 : i32
    return %arg1, %c0_i32, %c0_i32_0 : i32, i32, i32
  }
  func.func @transform_8(%arg0: i32, %arg1: i32) -> (i32, i32, i32) {
    %c0_i32 = arith.constant 0 : i32
    %c0_i32_0 = arith.constant 0 : i32
    %c0_i32_1 = arith.constant 0 : i32
    return %arg1, %c0_i32, %c0_i32_0 : i32, i32, i32
  }
  func.func @transform_9(%arg0: i32, %arg1: i32) -> (i32, i32, i32) {
    %c0_i32 = arith.constant 0 : i32
    %c0_i32_0 = arith.constant 0 : i32
    %c0_i32_1 = arith.constant 0 : i32
    return %arg1, %c0_i32, %c0_i32_0 : i32, i32, i32
  }
  func.func @transform_10(%arg0: i32, %arg1: i32) -> (i32, i32, i32) {
    %c0_i32 = arith.constant 0 : i32
    %c0_i32_0 = arith.constant 0 : i32
    %c0_i32_1 = arith.constant 0 : i32
    return %arg1, %c0_i32, %c0_i32_0 : i32, i32, i32
  }
  func.func @transform_11(%arg0: i32, %arg1: i32) -> (i32, i32, i32) {
    %c0_i32 = arith.constant 0 : i32
    %c0_i32_0 = arith.constant 0 : i32
    %c0_i32_1 = arith.constant 0 : i32
    return %arg1, %c0_i32, %c0_i32_0 : i32, i32, i32
  }
  func.func @transform_12(%arg0: i32, %arg1: i32) -> (i32, i32, i32) {
    %c0_i32 = arith.constant 0 : i32
    %c0_i32_0 = arith.constant 0 : i32
    %c0_i32_1 = arith.constant 0 : i32
    return %arg1, %c0_i32, %c0_i32_0 : i32, i32, i32
  }
  func.func @transform_13(%arg0: i32, %arg1: i32) -> (i32, i32) {
    %c0_i32 = arith.constant 0 : i32
    %c0_i32_0 = arith.constant 0 : i32
    %c0_i32_1 = arith.constant 0 : i32
    return %c0_i32, %c0_i32_0 : i32, i32
  }
  func.func @transform_14(%arg0: i32, %arg1: i32) -> (i32, i32) {
    %c0_i32 = arith.constant 0 : i32
    %c0_i32_0 = arith.constant 0 : i32
    %c0_i32_1 = arith.constant 0 : i32
    return %c0_i32, %c0_i32_0 : i32, i32
  }
  func.func @transform_15(%arg0: i32, %arg1: i32) -> (i32, i32) {
    %c0_i32 = arith.constant 0 : i32
    %c0_i32_0 = arith.constant 0 : i32
    %c0_i32_1 = arith.constant 0 : i32
    return %c0_i32, %c0_i32_0 : i32, i32
  }
  func.func @transform_16(%arg0: i32, %arg1: i32) -> (i32, i32) {
    %c0_i32 = arith.constant 0 : i32
    %c0_i32_0 = arith.constant 0 : i32
    %c0_i32_1 = arith.constant 0 : i32
    return %c0_i32, %c0_i32_0 : i32, i32
  }
  func.func @transform_17(%arg0: i32, %arg1: i32) -> (i32, i32) {
    %c0_i32 = arith.constant 0 : i32
    %c0_i32_0 = arith.constant 0 : i32
    %c0_i32_1 = arith.constant 0 : i32
    return %c0_i32, %c0_i32_0 : i32, i32
  }
  func.func @transform_18(%arg0: i32, %arg1: i32) -> (i32, i32) {
    %c0_i32 = arith.constant 0 : i32
    %c0_i32_0 = arith.constant 0 : i32
    %c0_i32_1 = arith.constant 0 : i32
    return %c0_i32, %c0_i32_0 : i32, i32
  }
  func.func @transform_19(%arg0: i32, %arg1: i32) -> (i32, i32, i32) {
    %c0_i32 = arith.constant 0 : i32
    %c0_i32_0 = arith.constant 0 : i32
    %c0_i32_1 = arith.constant 0 : i32
    return %arg0, %c0_i32, %c0_i32_0 : i32, i32, i32
  }
}

</mosaic_0001>

<bundles_post_ra>
// kernel: squeeze.2
= control target key start
LH: loop header
LB: loop body
LE: loop exit
PB: predicated region body
PF: predicated region fallthrough
CT: control target
= control target key end

     0   :  { %vm3_vm0 = vcmask 97280   ;;  %s271_s12 = smov 116   ;;  %s272_s30 = smov 104   ;;  %s490_s0 = inlined_call_operand.vmem [shape: f32[2,16,72], index: 0, kind: input, shape index: {}]   ;;  %s491_s1 = inlined_call_operand.vmem [shape: f32[2,2,8,6,12], index: 1, kind: output, shape index: {}]  }
   0x1   :  { %v216_v0 = vld [vmem:[%s490_s0 + $0x10] sm:$0xff]   ;;  %v27_v1 = vld [vmem:[%s490_s0] sm:$0xff]   ;;  %v219_v2 = vld [vmem:[%s490_s0 + $0x18] sm:$0xff]   ;;  %s273_s2 = smov 92   ;;  %s274_s3 = smov 80  }
   0x2   :  { %46 = vrot.lane.b32.xlu1 %v216_v0, %s271_s12  ;;  %28 = vrot.lane.b32.xlu0 %v27_v1, %s271_s12  ;;  %v213_v3 = vld [vmem:[%s490_s0 + $0x8] sm:$0xff]   ;;  %4 = vst.msk [vmem:[%s491_s1] ss:$8 sm:$0xf] %vm3_vm0, %v27_v1   ;;  %s275_s4 = smov 68  }
   0x3   :  { %5 = vst.msk [vmem:[%s491_s1] ss:$8 sm:$0xf0] %vm3_vm0, %v27_v1   ;;  %206 = vst.msk [vmem:[%s491_s1 + $0x80] ss:$8 sm:$0xf] %vm3_vm0, %v216_v0  }
   0x4   :  { %207 = vst.msk [vmem:[%s491_s1 + $0x80] ss:$8 sm:$0xf0] %vm3_vm0, %v216_v0   ;;  %209 = vst.msk [vmem:[%s491_s1 + $0xc0] ss:$8 sm:$0xf] %vm3_vm0, %v219_v2  }
   0x5   :  { %210 = vst.msk [vmem:[%s491_s1 + $0xc0] ss:$8 sm:$0xf0] %vm3_vm0, %v219_v2   ;;  %203 = vst.msk [vmem:[%s491_s1 + $0x40] ss:$8 sm:$0xf] %vm3_vm0, %v213_v3  }
   0x6   :  { %204 = vst.msk [vmem:[%s491_s1 + $0x40] ss:$8 sm:$0xf0] %vm3_vm0, %v213_v3   ;;  %55 = vrot.lane.b32.xlu1 %v219_v2, %s271_s12  ;;  %37 = vrot.lane.b32.xlu0 %v213_v3, %s271_s12 }
   0xa   :  { %72 = vrot.lane.b32.xlu1 %v213_v3, %s272_s30  ;;  %63 = vrot.lane.b32.xlu0 %v27_v1, %s272_s30 }
   0xe   :  { %90 = vrot.lane.b32.xlu1 %v219_v2, %s272_s30  ;;  %81 = vrot.lane.b32.xlu0 %v216_v0, %s272_s30 }
  0x12   :  { %107 = vrot.lane.b32.xlu1 %v213_v3, %s273_s2  ;;  %98 = vrot.lane.b32.xlu0 %v27_v1, %s273_s2 }
  0x16   :  { %125 = vrot.lane.b32.xlu1 %v219_v2, %s273_s2  ;;  %116 = vrot.lane.b32.xlu0 %v216_v0, %s273_s2 }
  0x1a   :  { %142 = vrot.lane.b32.xlu1 %v213_v3, %s274_s3  ;;  %133 = vrot.lane.b32.xlu0 %v27_v1, %s274_s3 }
  0x1e   :  { %160 = vrot.lane.b32.xlu1 %v219_v2, %s274_s3  ;;  %151 = vrot.lane.b32.xlu0 %v216_v0, %s274_s3 }
  0x22   :  { %177 = vrot.lane.b32.xlu1 %v213_v3, %s275_s4  ;;  %168 = vrot.lane.b32.xlu0 %v27_v1, %s275_s4 }
  0x26   :  { %195 = vrot.lane.b32.xlu1 %v219_v2, %s275_s4  ;;  %186 = vrot.lane.b32.xlu0 %v216_v0, %s275_s4 }
  0x74   :  { %v47_v4 = vpop.permute.xlu1 %46   ;;  %v29_v5 = vpop.permute.xlu0 %28  }
  0x75   :  { %217 = vst.msk [vmem:[%s491_s1 + $0x81] ss:$8 sm:$0xf] %vm3_vm0, %v47_v4   ;;  %218 = vst.msk [vmem:[%s491_s1 + $0x81] ss:$8 sm:$0xf0] %vm3_vm0, %v47_v4  }
  0x76   :  { %211 = vst.msk [vmem:[%s491_s1 + $0x1] ss:$8 sm:$0xf] %vm3_vm0, %v29_v5   ;;  %212 = vst.msk [vmem:[%s491_s1 + $0x1] ss:$8 sm:$0xf0] %vm3_vm0, %v29_v5  }
  0x78   :  { %v56_v6 = vpop.permute.xlu1 %55   ;;  %v38_v7 = vpop.permute.xlu0 %37  }
  0x79   :  { %220 = vst.msk [vmem:[%s491_s1 + $0xc1] ss:$8 sm:$0xf] %vm3_vm0, %v56_v6   ;;  %221 = vst.msk [vmem:[%s491_s1 + $0xc1] ss:$8 sm:$0xf0] %vm3_vm0, %v56_v6  }
  0x7a   :  { %214 = vst.msk [vmem:[%s491_s1 + $0x41] ss:$8 sm:$0xf] %vm3_vm0, %v38_v7   ;;  %215 = vst.msk [vmem:[%s491_s1 + $0x41] ss:$8 sm:$0xf0] %vm3_vm0, %v38_v7  }
  0x7c   :  { %v73_v8 = vpop.permute.xlu1 %72   ;;  %v64_v9 = vpop.permute.xlu0 %63  }
  0x7d   :  { %225 = vst.msk [vmem:[%s491_s1 + $0x42] ss:$8 sm:$0xf] %vm3_vm0, %v73_v8   ;;  %226 = vst.msk [vmem:[%s491_s1 + $0x42] ss:$8 sm:$0xf0] %vm3_vm0, %v73_v8  }
  0x7e   :  { %222 = vst.msk [vmem:[%s491_s1 + $0x2] ss:$8 sm:$0xf] %vm3_vm0, %v64_v9   ;;  %223 = vst.msk [vmem:[%s491_s1 + $0x2] ss:$8 sm:$0xf0] %vm3_vm0, %v64_v9  }
  0x80   :  { %v91_v10 = vpop.permute.xlu1 %90   ;;  %v82_v11 = vpop.permute.xlu0 %81  }
  0x81   :  { %231 = vst.msk [vmem:[%s491_s1 + $0xc2] ss:$8 sm:$0xf] %vm3_vm0, %v91_v10   ;;  %232 = vst.msk [vmem:[%s491_s1 + $0xc2] ss:$8 sm:$0xf0] %vm3_vm0, %v91_v10  }
  0x82   :  { %228 = vst.msk [vmem:[%s491_s1 + $0x82] ss:$8 sm:$0xf] %vm3_vm0, %v82_v11   ;;  %229 = vst.msk [vmem:[%s491_s1 + $0x82] ss:$8 sm:$0xf0] %vm3_vm0, %v82_v11  }
  0x84   :  { %v108_v12 = vpop.permute.xlu1 %107   ;;  %v99_v13 = vpop.permute.xlu0 %98  }
  0x85   :  { %236 = vst.msk [vmem:[%s491_s1 + $0x43] ss:$8 sm:$0xf] %vm3_vm0, %v108_v12   ;;  %237 = vst.msk [vmem:[%s491_s1 + $0x43] ss:$8 sm:$0xf0] %vm3_vm0, %v108_v12  }
  0x86   :  { %233 = vst.msk [vmem:[%s491_s1 + $0x3] ss:$8 sm:$0xf] %vm3_vm0, %v99_v13   ;;  %234 = vst.msk [vmem:[%s491_s1 + $0x3] ss:$8 sm:$0xf0] %vm3_vm0, %v99_v13  }
  0x88   :  { %v126_v14 = vpop.permute.xlu1 %125   ;;  %v117_v15 = vpop.permute.xlu0 %116  }
  0x89   :  { %242 = vst.msk [vmem:[%s491_s1 + $0xc3] ss:$8 sm:$0xf] %vm3_vm0, %v126_v14   ;;  %243 = vst.msk [vmem:[%s491_s1 + $0xc3] ss:$8 sm:$0xf0] %vm3_vm0, %v126_v14  }
  0x8a   :  { %239 = vst.msk [vmem:[%s491_s1 + $0x83] ss:$8 sm:$0xf] %vm3_vm0, %v117_v15   ;;  %240 = vst.msk [vmem:[%s491_s1 + $0x83] ss:$8 sm:$0xf0] %vm3_vm0, %v117_v15  }
  0x8c   :  { %v143_v16 = vpop.permute.xlu1 %142   ;;  %v134_v17 = vpop.permute.xlu0 %133  }
  0x8d   :  { %247 = vst.msk [vmem:[%s491_s1 + $0x44] ss:$8 sm:$0xf] %vm3_vm0, %v143_v16   ;;  %248 = vst.msk [vmem:[%s491_s1 + $0x44] ss:$8 sm:$0xf0] %vm3_vm0, %v143_v16  }
  0x8e   :  { %244 = vst.msk [vmem:[%s491_s1 + $0x4] ss:$8 sm:$0xf] %vm3_vm0, %v134_v17   ;;  %245 = vst.msk [vmem:[%s491_s1 + $0x4] ss:$8 sm:$0xf0] %vm3_vm0, %v134_v17  }
  0x90   :  { %v161_v18 = vpop.permute.xlu1 %160   ;;  %v152_v19 = vpop.permute.xlu0 %151  }
  0x91   :  { %253 = vst.msk [vmem:[%s491_s1 + $0xc4] ss:$8 sm:$0xf] %vm3_vm0, %v161_v18   ;;  %254 = vst.msk [vmem:[%s491_s1 + $0xc4] ss:$8 sm:$0xf0] %vm3_vm0, %v161_v18  }
  0x92   :  { %250 = vst.msk [vmem:[%s491_s1 + $0x84] ss:$8 sm:$0xf] %vm3_vm0, %v152_v19   ;;  %251 = vst.msk [vmem:[%s491_s1 + $0x84] ss:$8 sm:$0xf0] %vm3_vm0, %v152_v19  }
  0x94   :  { %v178_v20 = vpop.permute.xlu1 %177   ;;  %v169_v21 = vpop.permute.xlu0 %168  }
  0x95   :  { %258 = vst.msk [vmem:[%s491_s1 + $0x45] ss:$8 sm:$0xf] %vm3_vm0, %v178_v20   ;;  %259 = vst.msk [vmem:[%s491_s1 + $0x45] ss:$8 sm:$0xf0] %vm3_vm0, %v178_v20  }
  0x96   :  { %255 = vst.msk [vmem:[%s491_s1 + $0x5] ss:$8 sm:$0xf] %vm3_vm0, %v169_v21   ;;  %256 = vst.msk [vmem:[%s491_s1 + $0x5] ss:$8 sm:$0xf0] %vm3_vm0, %v169_v21  }
  0x98   :  { %v196_v22 = vpop.permute.xlu1 %195   ;;  %v187_v23 = vpop.permute.xlu0 %186  }
  0x99   :  { %264 = vst.msk [vmem:[%s491_s1 + $0xc5] ss:$8 sm:$0xf] %vm3_vm0, %v196_v22   ;;  %265 = vst.msk [vmem:[%s491_s1 + $0xc5] ss:$8 sm:$0xf0] %vm3_vm0, %v196_v22  }
  0x9a   :  { %261 = vst.msk [vmem:[%s491_s1 + $0x85] ss:$8 sm:$0xf] %vm3_vm0, %v187_v23   ;;  %262 = vst.msk [vmem:[%s491_s1 + $0x85] ss:$8 sm:$0xf0] %vm3_vm0, %v187_v23  }

// kernel: eegvit_forward.2
= control target key start
LH: loop header
LB: loop body
LE: loop exit
PB: predicated region body
PF: predicated region fallthrough
CT: control target
= control target key end

     0   :  { %vm75_vm0 = vcmask 785408   ;;  %vm130_vm1 = vcmask 261120   ;;  %s238_s1 = inlined_call_operand.vmem [shape: bf16[96,32], index: 1, kind: input, shape index: {}]   ;;  %s239_s0 = inlined_call_operand.vmem [shape: f32[24,96], index: 0, kind: input, shape index: {}]   ;;  %s240_s2 = inlined_call_operand.vmem [shape: f32[1,32], index: 2, kind: input, shape index: {}]   ;;  %s241_s3 = inlined_call_operand.vmem [shape: f32[24,32], index: 3, kind: output, shape index: {}]  }
   0x1   :  { %v171_v0 = vld [vmem:[%s238_s1 + $0x28] sm:$0xff]   ;;  %v172_v1 = vld [vmem:[%s238_s1 + $0x20] sm:$0xff]   ;;  %v173_v2 = vld [vmem:[%s238_s1 + $0x18] sm:$0xff]  }
   0x2   :  { %155 = vmatprep.subr.bf16.mxu0 %v171_v0  ;;  %v15_v3 = vld [vmem:[%s239_s0] sm:$0xff]  ;;  %v16_v4 = vld [vmem:[%s239_s0 + $0x8] sm:$0xff]  ;;  %v174_v6 = vld [vmem:[%s238_s1 + $0x10] sm:$0xff]  }
   0x3   :  { %156 = vmatpush3.bf16.msra.mxu0 %v171_v0  ;;  %v18_v5 = vpack.c.bf16 %v16_v4, %v15_v3  ;;  %v175_v7 = vld [vmem:[%s238_s1 + $0x8] sm:$0xff]   ;;  %v176_v8 = vld [vmem:[%s238_s1] sm:$0xff]   ;;  %v17_v9 = vld [vmem:[%s239_s0 + $0x10] sm:$0xff] }
   0x4   :  { %157 = vmatprep.subr.bf16.mxu0 %v172_v1  ;;  %v19_v10 = vpack.c.bf16 %v17_v9, %v17_v9  ;;  %v138_v11 = vld [vmem:[%s240_s2] ss:$0 sm:$0xff] }
   0x5   :  { %167 = vmatprep.mubr.msk.bf16.mxu0 %vm75_vm0, %v18_v5 }
   0x7   :  { %158 = vmatpush3.bf16.msra.mxu0 %v172_v1 }
   0x8   :  { %159 = vmatprep.subr.bf16.mxu0 %v173_v2 }
   0xb   :  { %160 = vmatpush3.bf16.msra.mxu0 %v173_v2 }
   0xc   :  { %161 = vmatprep.subr.bf16.mxu0 %v174_v6 }
   0xf   :  { %162 = vmatpush3.bf16.msra.mxu0 %v174_v6 }
  0x10   :  { %163 = vmatprep.subr.bf16.mxu0 %v175_v7 }
  0x13   :  { %164 = vmatpush3.bf16.msra.mxu0 %v175_v7 }
  0x14   :  { %165 = vmatprep.subr.bf16.mxu0 %v176_v8 }
  0x17   :  { %166 = vmatpush3.bf16.msra.mxu0 %v176_v8 }
  0x1a   :  { %168 = vmatmul.mubr.msk.bf16.vlgmr.msra.gmra.mxu0 %vm75_vm0, %v19_v10 }
  0xda   :  { %v169_v12 = vpop.f32.mrf.mxu0 }
  0xdb   :  { %v125_v13 = vadd.f32 %v169_v12, %v138_v11 }
  0xdc   :  { %v116_v14 = vpop.f32.mrf.mxu0 }
  0xdd   :  { %133 = vst.msk [vmem:[%s241_s3 + $0x10] sm:$0xff] %vm130_vm1, %v125_v13  ;;  %v117_v15 = vadd.f32 %v138_v11, %v116_v14 }
  0xde   :  { %v170_v16 = vpop.f32.mrf.mxu0 }
  0xdf   :  { %131 = vst.msk [vmem:[%s241_s3] sm:$0xff] %vm130_vm1, %v117_v15 }
  0xe0   :  { %v119_v17 = vpop.f32.mrf.mxu0 }
  0xe1   :  { %v120_v18 = vadd.f32 %v138_v11, %v119_v17 }
  0xe3   :  { %132 = vst.msk [vmem:[%s241_s3 + $0x8] sm:$0xff] %vm130_vm1, %v120_v18 }

// kernel: eegvit_forward.3
= control target key start
LH: loop header
LB: loop body
LE: loop exit
PB: predicated region body
PF: predicated region fallthrough
CT: control target
= control target key end

     0   :  { %s3205_s0 = inlined_call_operand.vmem [shape: f32[2,13,32], index: 0, kind: input, shape index: {}]   ;;  %s3206_s1 = inlined_call_operand.vmem [shape: f32[2,1,32], index: 1, kind: input, shape index: {}]   ;;  %s3207_s2 = inlined_call_operand.vmem [shape: f32[2,1,32], index: 2, kind: input, shape index: {}]   ;;  %s3208_s3 = inlined_call_operand.vmem [shape: bf16[2,32,96], index: 3, kind: input, shape index: {}]   ;;  %s3209_s4 = inlined_call_operand.vmem [shape: f32[2,1,96], index: 4, kind: input, shape index: {}]   ;;  %s3210_s5 = inlined_call_operand.vmem [shape: bf16[2,4,8,32], index: 5, kind: input, shape index: {}]   ;;  %s3211_s6 = inlined_call_operand.vmem [shape: f32[2,1,32], index: 6, kind: input, shape index: {}]   ;;  %s3212_s7 = inlined_call_operand.vmem [shape: f32[2,1,32], index: 7, kind: input, shape index: {}]   ;;  %s3213_s8 = inlined_call_operand.vmem [shape: f32[2,1,32], index: 8, kind: input, shape index: {}]   ;;  %s3214_s9 = inlined_call_operand.vmem [shape: bf16[2,32,64], index: 9, kind: input, shape index: {}]   ;;  %s3215_s10 = inlined_call_operand.vmem [shape: f32[2,1,64], index: 10, kind: input, shape index: {}]   ;;  %s3216_s11 = inlined_call_operand.vmem [shape: bf16[2,64,32], index: 11, kind: input, shape index: {}]   ;;  %s3217_s12 = inlined_call_operand.vmem [shape: f32[2,1,32], index: 12, kind: input, shape index: {}]   ;;  %s3218_s13 = inlined_call_operand.vmem [shape: f32[1,32], index: 13, kind: input, shape index: {}]   ;;  %s3219_s14 = inlined_call_operand.vmem [shape: f32[1,32], index: 14, kind: input, shape index: {}]   ;;  %s3220_s15 = inlined_call_operand.vmem [shape: bf16[32,32], index: 15, kind: input, shape index: {}]   ;;  %s3221_s16 = inlined_call_operand.vmem [shape: f32[1,32], index: 16, kind: input, shape index: {}]   ;;  %s3222_s17 = inlined_call_operand.vmem [shape: bf16[32,2], index: 17, kind: input, shape index: {}]   ;;  %s3223_s18 = inlined_call_operand.vmem [shape: f32[1,2], index: 18, kind: input, shape index: {}]   ;;  %s3224_s19 = inlined_call_operand.hbm [shape: f32[2,1,2], index: 19, kind: output, shape index: {}]  }
   0x1   :  { %3240 = sst [smem:[#allocation18_spill]] %s3205_s0 }
   0x2   :  { %3241 = sst [smem:[#allocation19_spill]] %s3206_s1 }
   0x3   :  { %3242 = sst [smem:[#allocation20_spill]] %s3207_s2 }
   0x4   :  { %3243 = sst [smem:[#allocation21_spill]] %s3208_s3 }
   0x5   :  { %3244 = sst [smem:[#allocation22_spill]] %s3218_s13 }
   0x6   :  { %3245 = sst [smem:[#allocation23_spill]] %s3219_s14 }
   0x7   :  { %3246 = sst [smem:[#allocation24_spill]] %s3220_s15 }
   0x8   :  { %3247 = sst [smem:[#allocation25_spill]] %s3221_s16 }
   0x9   :  { %3248 = sst [smem:[#allocation26_spill]] %s3222_s17 }
   0xa   :  { %3249 = sst [smem:[#allocation27_spill]] %s3223_s18 }
   0xb   :  { %3250 = sst [smem:[#allocation28_spill]] %s3224_s19 }
   0xc   :  { %24 = vsyncpa [#allocation4], 0 }
   0xd   :  { %26 = vsyncpa [#allocation4 + $0x1], 0  ;;  %s2796_s0 = smov 0   ;;  %s2798_s30 = smov 0  }
   0xe   :  { %s2800_s20 = smov 0   ;;  %s2802_s21 = smov 0  }
   0xf   :  { %s2804_s1 = smov 0   ;;  %s2806_s22 = smov 0  }
  0x10   :  { %s2808_s2 = smov 0   ;;  %s2810_s23 = smov 0  }
  0x11 LB: > { %3251 = sst [smem:[#allocation6_spill]] %s2649_s0  ;;  %s2218_s24 = sadd.s32 4294967295, %s2677_s23   ;;  %s2677_s23 = sphi %s2810_s23, %s32_s23   ;;  %s2673_s2 = sphi %s2808_s2, %s3298_s2   ;;  %s2669_s22 = sphi %s2806_s22, %s3297_s22   ;;  %s2665_s1 = sphi %s2804_s1, %s3296_s1   ;;  %s2661_s21 = sphi %s2802_s21, %s3295_s21   ;;  %s2657_s20 = sphi %s2800_s20, %s3294_s20   ;;  %s2653_s30 = sphi %s2798_s30, %s3300_s30   ;;  %s2649_s0 = sphi %s2796_s0, %s3299_s0  }
  0x12   : > { %3252 = sst [smem:[#allocation7_spill]] %s2657_s20  ;;  %s2219_s25 = sadd.s32 4294967294, %s2677_s23  }
  0x13   : > { %3253 = sst [smem:[#allocation8_spill]] %s2661_s21  ;;  %s41_s3 = sadd.s32 1, %s2669_s22 }
  0x14   : > { %3254 = sst [smem:[#allocation9_spill]] %s2665_s1  ;;  %p42_p0 = scmp.ge.s32.totalorder %s41_s3, 2 }
  0x15   : > { %3255 = sst [smem:[#allocation10_spill]] %s2669_s22  ;;  %s44_s26 = sadd.s32 1, %s2673_s2 }
  0x16   : > { %3256 = sst [smem:[#allocation11_spill]] %s2673_s2  ;;  %p525_p1 = scmp.ne.s32.totalorder %s2657_s20, %s2653_s30 }
  0x17   : > { %3257 = sst [smem:[#allocation12_spill]] %s2677_s23  ;;  %p526_p2 = scmp.eq.s32.totalorder %s2218_s24, 3 }
  0x18   : > { %s3302_s3 = smov (%p42_p0, %s41_s3), 0  ;;  %s3304_s26 = smov (!%p42_p0, %s44_s26), %s2673_s2 }
  0x19   : > { %3258 = sst [smem:[#allocation13_spill]] %s3302_s3  ;;  %p2845_p3 = por %p526_p2, %p525_p1 }
  0x1a   : > { %p531_p4 = scmp.ne.s32.totalorder %s2653_s30, %s2649_s0  ;;  %p46_p5 = scmp.ge.s32.totalorder %s3304_s26, 2 }
  0x1b   : > { %s3259_s27 = scalar_select %p2845_p3, 1, 0 }
  0x1c   : > { %p532_p6 = scmp.eq.s32.totalorder %s2219_s25, 3  ;;  %p2222_p7 = scmp.ge.s32.totalorder %s2677_s23, 1 }
  0x1d   : > { %3260 = sst [smem:[#allocation14_spill]] %s3259_s27  ;;  %p656_p8 = scmp.lt.s32.totalorder %s2677_s23, 5 }
  0x1e   : > { %s3306_s26 = smov (%p46_p5, %s3304_s26), 0  ;;  %p2855_p9 = por %p532_p6, %p531_p4 }
  0x1f   : > { %3261 = sst [smem:[#allocation15_spill]] %s3306_s26  ;;  %p657_p10 = pnand %p2222_p7, %p656_p8 }
  0x20   : > { %s3262_s28 = scalar_select %p2855_p9, 1, 0 }
  0x21   : > { %s512_s29 = ssub.s32 %s2673_s2, %s3306_s26  ;;  %s515_s24 = sadd.s32 1, %s2657_s20 }
  0x22   : > { %3263 = sst [smem:[#allocation16_spill]] %s3262_s28  ;;  %p513_p11 = scmp.eq.s32.totalorder %s512_s29, 0 }
  0x23   : > { %660 = sbr.rel (%p657_p10) target bundleno = 4340 (0x10f4), region = 96  ;;  %p755_p12 = scmp.lt.s32.totalorder (!%p657_p10), %s2665_s1, 1 }
  0x24   : > { %s2863_s3 = scalar_select %p513_p11, %s2657_s20, %s515_s24  }
  0x25   : > { %p760_p13 = scmp.lt.s32.totalorder (!%p657_p10), %s2661_s21, 1  ;;  %s3265_s2 = sld [smem:[#allocation18_spill]] (!%p657_p10) }
  0x26   : > { %3264 = sst [smem:[#allocation17_spill]] %s2863_s3  ;;  %s3269_s13 = sand.u32 (!%p657_p10), 1, %s2653_s30  }
  0x27   : > { %s3268_s17 = sld [smem:[#allocation21_spill]] (!%p657_p10)  ;;  %s2931_s14 = scalar_lea.vmem (!%p657_p10), [#allocation3], %s3269_s13 }
  0x28   : > { %s756_s22 = scalar_select %p755_p12, %s2665_s1, 1 }
  0x29   : > { %s2870_s0 = scalar_select %p760_p13, %s2661_s21, 1 }
  0x2a   : > { %s2278_s29 = sshll.u32 %s756_s22, 4  ;;  %s3270_s18 = sld [smem:[#allocation8_spill]] }
  0x2b   : > { %s759_s25 = scalar_lea.vmem %s3265_s2, %s2278_s29  ;;  %s2279_s16 = sshll.u32 %s2870_s0, 4 }
  0x2c   : > { %s2896_s29 = scalar_lea.vmem %s3210_s5, %s2279_s16  ;;  %s2913_s22 = scalar_lea.vmem %s3214_s9, %s2279_s16 }
  0x2d   : > { %s2887_s15 = scalar_lea.vmem %s3268_s17, %s2279_s16  ;;  %s787_s17 = scalar_lea.vmem %s3213_s8, %s2870_s0 }
  0x2e   : > { %s795_s26 = scalar_lea.vmem %s3215_s10, %s2870_s0  ;;  %s2282_s23 = sshll.u32 %s2870_s0, 5 }
  0x2f   : > { %s803_s19 = scalar_lea.vmem %s3217_s12, %s2870_s0  ;;  %s2927_s28 = scalar_lea.vmem %s3216_s11, %s2282_s23 }
  0x30   : > { %p2233_p0 = scmp.ne.s32.totalorder %s3270_s18, 0 }
  0x32   : > { %808 = sbr.rel (%p2233_p0) target bundleno = 58 (0x3a), region = 100 }
  0x37   : > { %v809_v0 = vld [vmem:[%s759_s25] sm:$0xff]  ;;  %vm811_vm0 = vcmask 261120   ;;  %v810_v1 = vld [vmem:[%s759_s25 + $0x8] sm:$0x1f]  ;;  %vm813_vm1 = vcmask 258048  }
  0x38   : > { %812 = vst.msk [vmem:[#allocation2] sm:$0xff] %vm811_vm0, %v809_v0 }
  0x39   : > { %814 = vst.msk [vmem:[#allocation2 + $0x8] sm:$0x1f] %vm813_vm1, %v810_v1 }
  0x3a PF: > { %vm819_vm2 = vcmask 261120   ;;  %vm823_vm3 = vcmask 258048   ;;  %v2527_v16 = vld [vmem:[%s2887_s15 + $0x8] sm:$0xff]   ;;  %v2679_v17 = vmov 0.0   ;;  %vm2680_vm4 = vmmov 0   ;;  %v2528_v18 = vld [vmem:[%s2887_s15] sm:$0xff]   ;;  %s3275_s27 = scalar_lea.vmem %s3209_s4, %s2870_s0 }
  0x3b   : > { %2324 = vmatprep.subr.bf16.mxu1 %v2679_v17  ;;  %2328 = vmatprep.mubr.msk.bf16.mxu1 %vm2680_vm4, %v2679_v17  ;;  %s3271_s23 = sld [smem:[#allocation19_spill]]  ;;  %v2236_v37 = vld [vmem:[%s3275_s27] ss:$0 sm:$0xff]  ;;  %s2681_s13 = smov 88   ;;  %vm936_vm5 = vcmask 64512   ;;  %vm986_vm6 = vcmask 105472  }
  0x3c   : > { %2325 = vmatpush3.bf16.msra.mxu1 %v2527_v16  ;;  %2338 = vmatprep.subr.bf16.mxu0 %v2679_v17  ;;  %s3273_s2 = sld [smem:[#allocation20_spill]]  ;;  %s2682_s18 = smov 96   ;;  %vm990_vm7 = vcmask 102400   ;;  %vm1016_vm8 = vcmask 1045504   ;;  %vm1017_vm9 = vcmask 1046528   ;;  %vm1197_vm10 = vcmask 1043456  }
  0x3d   : > { %2326 = vmatprep.subr.bf16.mxu1 %v2679_v17  ;;  %2340 = vmatprep.mubr.msk.bf16.mxu0 %vm2680_vm4, %v2679_v17  ;;  %s2683_s15 = smov 120   ;;  %s2684_s16 = smov 64   ;;  %vm1824_vm11 = vcmask 523264  }
  0x3e   : > { %s2687_s21 = smov 56   ;;  %s2689_s24 = smov 48  }
  0x3f   : > { %v2934_v2 = vld [vmem:[#allocation2] sm:$0xff]  ;;  %s2692_s3 = smov 40  }
  0x40   : > { %v2936_v3 = vld [vmem:[#allocation2 + $0x8] sm:$0x1f]  ;;  %v820_v4 = vsel %vm819_vm2, %v2934_v2, 0.0  ;;  %2327 = vmatpush3.bf16.msra.mxu1 %v2528_v18 }
  0x41   : > { %v824_v5 = vsel %vm823_vm3, %v2936_v3, 0.0  ;;  %821 = vadd.xlane.f32.xlu0 %v820_v4  ;;  %2332 = vmatprep.subr.bf16.mxu1 %v2679_v17  ;;  %s3272_s25 = scalar_lea.vmem %s3271_s23, %s2870_s0  ;;  %s2685_s23 = smov 80  }
  0x42   : > { %v2234_v27 = vld [vmem:[%s3272_s25] ss:$0 sm:$0xff]  ;;  %s3274_s20 = scalar_lea.vmem %s3273_s2, %s2870_s0  ;;  %s2686_s25 = smov 112  }
  0x43   : > { %v2235_v31 = vld [vmem:[%s3274_s20] ss:$0 sm:$0xff]  ;;  %s2690_s2 = smov 104   ;;  %s2691_s20 = smov 72  }
  0x45   : > { %825 = vadd.xlane.f32.xlu0 %v824_v5 }
  0xca   : > { %v822_v6 = vpop.xlane.xlu0 %821 }
  0xcb   : > { %v828_v7 = vmul.f32 0.03125, %v822_v6 }
  0xcd   : > { %v830_v8 = vsub.f32 %v2934_v2, %v828_v7 }
  0xce   : > { %v826_v9 = vpop.xlane.xlu0 %825 }
  0xcf   : > { %v829_v10 = vmul.f32 0.03125, %v826_v9  ;;  %v832_v11 = vmul.f32 %v830_v8, %v830_v8 }
  0xd1   : > { %v831_v12 = vsub.f32 %v2936_v3, %v829_v10  ;;  %v834_v13 = vsel %vm819_vm2, %v832_v11, 0.0 }
  0xd2   : > { %835 = vadd.xlane.f32.xlu1 %v834_v13 }
  0xd3   : > { %v833_v14 = vmul.f32 %v831_v12, %v831_v12 }
  0xd5   : > { %v837_v15 = vsel %vm823_vm3, %v833_v14, 0.0 }
  0xd6   : > { %838 = vadd.xlane.f32.xlu1 %v837_v15 }
 0x15b   : > { %v836_v19 = vpop.xlane.xlu1 %835 }
 0x15c   : > { %v840_v20 = vmul.f32 0.03125, %v836_v19 }
 0x15e   : > { %v842_v21 = vadd.f32 1e-12, %v840_v20 }
 0x15f   : > { %v839_v22 = vpop.xlane.xlu1 %838 }
 0x160   : > { %2535 = vrsqrt.f32 %v842_v21  ;;  %v841_v23 = vmul.f32 0.03125, %v839_v22 }
 0x162   : > { %v843_v24 = vadd.f32 1e-12, %v841_v23 }
 0x164   : > { %2537 = vrsqrt.f32 %v843_v24 }
 0x16d   : > { %v2536_v25 = vpop.eup %2535 }
 0x16e   : > { %v846_v26 = vmul.f32 %v2536_v25, %v830_v8 }
 0x170   : > { %v854_v30 = vmul.f32 %v2234_v27, %v846_v26  ;;  %v2688_v26 = vmov 65535  }
 0x171   : > { %v2538_v28 = vpop.eup %2537 }
 0x172   : > { %v847_v29 = vmul.f32 %v2538_v28, %v831_v12  ;;  %v862_v33 = vadd.f32 %v2235_v31, %v854_v30 }
 0x174   : > { %v855_v32 = vmul.f32 %v2234_v27, %v847_v29  ;;  %v1018_v27 = vsel %vm1016_vm8, 4294967295, %v2688_v26 }
 0x175   : > { %v3002_v29 = vsel %vm1017_vm9, %v1018_v27, 0 }
 0x176   : > { %v863_v34 = vadd.f32 %v2235_v31, %v855_v32 }
 0x178   : > { %v864_v35 = vpack.c.bf16 %v863_v34, %v862_v33 }
 0x17a   : > { %2329 = vmatmul.mubr.msk.bf16.vlgmr.msra.gmra.mxu1 %vm819_vm2, %v864_v35 }
 0x17b   : > { %2334 = vmatprep.mubr.msk.bf16.mxu1 %vm2680_vm4, %v2679_v17 }
 0x23a   : > { %v925_v36 = vpop.f32.mrf.mxu1 }
 0x23b   : > { %v926_v40 = vadd.f32 %v2236_v37, %v925_v36 }
 0x23c   : > { %v2330_v38 = vpop.f32.mrf.mxu1 }
 0x23e   : > { %v928_v39 = vpop.f32.mrf.mxu1 }
 0x23f   : > { %v929_v41 = vadd.f32 %v2236_v37, %v928_v39 }
 0x240   : > { %v2331_v42 = vpop.f32.mrf.mxu1 }
 0x241   : > { %v2974_v43 = vpack.c.bf16 %v929_v41, %v926_v40 }
 0x243   : > { %1068 = vrot.lane.b32.xlu1 %v2974_v43, %s2681_s13  ;;  %934 = vrot.lane.b32.xlu0 %v2974_v43, %s2682_s18 }
 0x247   : > { %1066 = vrot.lane.b32.xlu1 %v2974_v43, %s2683_s15 }
 0x2b5   : > { %v935_v44 = vpop.permute.xlu0 %934  ;;  %v1069_v46 = vpop.permute.xlu1 %1068 }
 0x2b6   : > { %v941_v45 = vsel %vm936_vm5, %v935_v44, 0  ;;  %v1074_v47 = vsel %vm936_vm5, %v1069_v46, 0  ;;  %v1065_v46 = vld [vmem:[%s2896_s29] sm:$0xf] }
 0x2b7   : > { %2333 = vmatpush3.bf16.xpose.msra.mxu1 %v941_v45 }
 0x2b8   : > { %2344 = vmatprep.subr.bf16.mxu1 %v2679_v17 }
 0x2b9   : > { %v1067_v48 = vpop.permute.xlu1 %1066 }
 0x2be   : > { %2335 = vmatmul.mubr.msk.bf16.vlgmr.msra.gmra.mxu1 %vm936_vm5, %v2974_v43 }
 0x2bf   : > { %2345 = vmatpush3.bf16.xpose.msra.mxu1 %v1074_v47  ;;  %2346 = vmatprep.mubr.msk.bf16.mxu1 %vm2680_vm4, %v2679_v17  ;;  %v1246_v47 = vsel %vm1197_vm10, %v1065_v46, 0 }
 0x2c0   : > { %2356 = vmatprep.subr.bf16.mxu1 %v2679_v17 }
 0x2c6   : > { %2347 = vmatmul.mubr.msk.bf16.vlgmr.msra.gmra.mxu1 %vm936_vm5, %v1067_v48  ;;  %v2244_v48 = vld [vmem:[%s2896_s29 + $0x4] sm:$0xf] }
 0x2c7   : > { %2358 = vmatprep.mubr.msk.bf16.mxu1 %vm2680_vm4, %v2679_v17 }
 0x37e   : > { %v977_v49 = vpop.f32.mrf.mxu1 }
 0x37f   : > { %v984_v50 = vmul.f32 0.35355338, %v977_v49  ;;  %v1199_v49 = vsel %vm1197_vm10, %v2244_v48, 0 }
 0x380   : > { %v2336_v51 = vpop.f32.mrf.mxu1  ;;  %2357 = vmatpush3.bf16.msra.mxu1 %v1199_v49 }
 0x381   : > { %v987_v52 = vsel %vm986_vm6, %v984_v50, -inf  ;;  %2368 = vmatprep.subr.bf16.mxu1 %v2679_v17 }
 0x382   : > { %988 = vmax.xlane.f32.xlu1 %v987_v52  ;;  %v980_v53 = vpop.f32.mrf.mxu1 }
 0x383   : > { %v985_v54 = vmul.f32 0.35355338, %v980_v53 }
 0x384   : > { %v2337_v55 = vpop.f32.mrf.mxu1 }
 0x385   : > { %v991_v56 = vsel %vm990_vm7, %v985_v54, -inf }
 0x386   : > { %992 = vmax.xlane.f32.xlu0 %v991_v56  ;;  %v1110_v57 = vpop.f32.mrf.mxu1 }
 0x387   : > { %v1117_v58 = vmul.f32 0.35355338, %v1110_v57 }
 0x388   : > { %v2348_v59 = vpop.f32.mrf.mxu1 }
 0x389   : > { %v1119_v60 = vsel %vm986_vm6, %v1117_v58, -inf }
 0x38a   : > { %1120 = vmax.xlane.f32.xlu0 %v1119_v60  ;;  %v1113_v61 = vpop.f32.mrf.mxu1 }
 0x38b   : > { %v1118_v62 = vmul.f32 0.35355338, %v1113_v61 }
 0x38c   : > { %v2349_v63 = vpop.f32.mrf.mxu1 }
 0x38d   : > { %v1122_v0 = vsel %vm990_vm7, %v1118_v62, -inf }
 0x38e   : > { %1123 = vmax.xlane.f32.xlu0 %v1122_v0 }
 0x40b   : > { %v989_v1 = vpop.xlane.xlu1 %988 }
 0x40c   : > { %v994_v4 = vsub.f32 %v984_v50, %v989_v1 }
 0x40e   : > { %v996_v5 = vmul.f32 1.442695, %v994_v4 }
 0x40f   : > { %v993_v6 = vpop.xlane.xlu0 %992 }
 0x410   : > { %2539 = vpow2.f32 %v996_v5  ;;  %v995_v7 = vsub.f32 %v985_v54, %v993_v6 }
 0x412   : > { %v998_v8 = vmul.f32 1.442695, %v995_v7 }
 0x413   : > { %v1121_v9 = vpop.xlane.xlu0 %1120 }
 0x414   : > { %2541 = vpow2.f32 %v998_v8  ;;  %v1125_v10 = vsub.f32 %v1117_v58, %v1121_v9 }
 0x416   : > { %v1127_v11 = vmul.f32 1.442695, %v1125_v10 }
 0x417   : > { %v1124_v12 = vpop.xlane.xlu0 %1123 }
 0x418   : > { %2543 = vpow2.f32 %v1127_v11  ;;  %v1126_v13 = vsub.f32 %v1118_v62, %v1124_v12 }
 0x41a   : > { %v1129_v14 = vmul.f32 1.442695, %v1126_v13 }
 0x41c   : > { %2545 = vpow2.f32 %v1129_v14 }
 0x41d   : > { %v2540_v15 = vpop.eup %2539 }
 0x41e   : > { %v1000_v16 = vsel %vm986_vm6, %v2540_v15, 0.0 }
 0x41f   : > { %1001 = vadd.xlane.f32.xlu1 %v1000_v16 }
 0x421   : > { %v2542_v18 = vpop.eup %2541 }
 0x422   : > { %v1003_v19 = vsel %vm990_vm7, %v2542_v18, 0.0 }
 0x423   : > { %1004 = vadd.xlane.f32.xlu0 %v1003_v19 }
 0x425   : > { %v2544_v20 = vpop.eup %2543 }
 0x426   : > { %v1131_v21 = vsel %vm986_vm6, %v2544_v20, 0.0 }
 0x427   : > { %1132 = vadd.xlane.f32.xlu1 %v1131_v21 }
 0x429   : > { %v2546_v22 = vpop.eup %2545 }
 0x42a   : > { %v1134_v23 = vsel %vm990_vm7, %v2546_v22, 0.0 }
 0x42b   : > { %1135 = vadd.xlane.f32.xlu0 %v1134_v23 }
 0x438   : > { %1011 = vrot.lane.b32.xlu1 %v2974_v43, %s2684_s16 }
 0x43c   : > { %1291 = vrot.lane.b32.xlu1 %v2974_v43, %s2685_s23 }
 0x440   : > { %1289 = vrot.lane.b32.xlu1 %v2974_v43, %s2686_s25  ;;  %s3278_s25 = sld [smem:[#allocation8_spill]] }
 0x441   : > { %1142 = vrot.lane.b32.xlu0 %v2974_v43, %s2687_s21 }
 0x446   : > { %p2268_p1 = scmp.ne.s32.totalorder %s3278_s25, 1 }
 0x447   : > { %s3279_s21 = sld [smem:[#allocation24_spill]] (!%p2268_p1) }
 0x448   : > { %s3281_s27 = sld [smem:[#allocation26_spill]] (!%p2268_p1) }
 0x449   : > { %s3282_s18 = sld [smem:[#allocation22_spill]] (!%p2268_p1) }
 0x44a   : > { %s3283_s16 = sld [smem:[#allocation23_spill]] (!%p2268_p1) }
 0x44b   : > { %s3284_s25 = sld [smem:[#allocation25_spill]] (!%p2268_p1) }
 0x4a8   : > { %v1002_v24 = vpop.xlane.xlu1 %1001 }
 0x4a9   : > { %2547 = vrcp.f32 %v1002_v24 }
 0x4ac   : > { %v1005_v25 = vpop.xlane.xlu0 %1004 }
 0x4ad   : > { %2549 = vrcp.f32 %v1005_v25 }
 0x4b0   : > { %v1133_v28 = vpop.xlane.xlu1 %1132 }
 0x4b1   : > { %2551 = vrcp.f32 %v1133_v28 }
 0x4b4   : > { %v1012_v30 = vpop.permute.xlu1 %1011  ;;  %v1136_v31 = vpop.xlane.xlu0 %1135 }
 0x4b5   : > { %v1021_v32 = vand.u32 %v3002_v29, %v1012_v30  ;;  %2553 = vrcp.f32 %v1136_v31 }
 0x4b6   : > { %v2548_v33 = vpop.eup %2547 }
 0x4b7   : > { %2339 = vmatpush3.bf16.msra.mxu0 %v1021_v32  ;;  %v1008_v36 = vmul.f32 %v2548_v33, %v2540_v15 }
 0x4b8   : > { %2350 = vmatprep.subr.bf16.mxu0 %v2679_v17  ;;  %v1143_v35 = vpop.permute.xlu0 %1142  ;;  %v1292_v57 = vpop.permute.xlu1 %1291 }
 0x4b9   : > { %v1148_v39 = vand.u32 %v1143_v35, %v3002_v29  ;;  %v1297_v61 = vsel %vm936_vm5, %v1292_v57, 0 }
 0x4ba   : > { %v2550_v34 = vpop.eup %2549 }
 0x4bb   : > { %v1009_v37 = vmul.f32 %v2550_v34, %v2542_v18 }
 0x4bc   : > { %v1290_v62 = vpop.permute.xlu1 %1289 }
 0x4bd   : > { %v1010_v38 = vpack.c.bf16 %v1009_v37, %v1008_v36 }
 0x4be   : > { %v2552_v40 = vpop.eup %2551 }
 0x4bf   : > { %2341 = vmatmul.mubr.msk.bf16.vlgmr.msra.gmra.mxu0 %vm986_vm6, %v1010_v38  ;;  %v1139_v42 = vmul.f32 %v2552_v40, %v2544_v20 }
 0x4c0   : > { %2351 = vmatpush3.bf16.msra.mxu0 %v1148_v39  ;;  %2352 = vmatprep.mubr.msk.bf16.mxu0 %vm2680_vm4, %v2679_v17 }
 0x4c1   : > { %2362 = vmatprep.subr.bf16.mxu0 %v2679_v17 }
 0x4c2   : > { %v2554_v41 = vpop.eup %2553 }
 0x4c3   : > { %v1140_v44 = vmul.f32 %v2554_v41, %v2546_v22 }
 0x4c5   : > { %v1141_v45 = vpack.c.bf16 %v1140_v44, %v1139_v42  ;;  %v2249_v44 = vld [vmem:[%s2896_s29 + $0x8] sm:$0xf] }
 0x4c7   : > { %2353 = vmatmul.mubr.msk.bf16.vlgmr.msra.gmra.mxu0 %vm986_vm6, %v1141_v45  ;;  %v1421_v45 = vsel %vm1197_vm10, %v2249_v44, 0 }
 0x4c8   : > { %2364 = vmatprep.mubr.msk.bf16.mxu0 %vm2680_vm4, %v2679_v17  ;;  %2363 = vmatpush3.bf16.msra.mxu0 %v1246_v47 }
 0x4c9   : > { %2374 = vmatprep.subr.bf16.mxu0 %v2679_v17 }
 0x57f   : > { %v1057_v50 = vpop.f32.mrf.mxu0 }
 0x581   : > { %v2342_v51 = vpop.f32.mrf.mxu0 }
 0x583   : > { %v1060_v52 = vpop.f32.mrf.mxu0 }
 0x584   : > { %v1064_v53 = vpack.c.bf16 %v1060_v52, %v1057_v50 }
 0x585   : > { %v2343_v54 = vpop.f32.mrf.mxu0 }
 0x586   : > { %2365 = vmatmul.mubr.msk.bf16.vlgmr.msra.gmra.mxu0 %vm936_vm5, %v1064_v53 }
 0x587   : > { %v1184_v55 = vpop.f32.mrf.mxu0  ;;  %2376 = vmatprep.mubr.msk.bf16.mxu0 %vm2680_vm4, %v2679_v17 }
 0x589   : > { %v2354_v56 = vpop.f32.mrf.mxu0 }
 0x58b   : > { %v1187_v58 = vpop.f32.mrf.mxu0 }
 0x58c   : > { %v1191_v59 = vpack.c.bf16 %v1187_v58, %v1184_v55 }
 0x58d   : > { %v2355_v60 = vpop.f32.mrf.mxu0 }
 0x58e   : > { %2359 = vmatmul.mubr.msk.bf16.vlgmr.msra.gmra.mxu1 %vm936_vm5, %v1191_v59 }
 0x58f   : > { %2369 = vmatpush3.bf16.xpose.msra.mxu1 %v1297_v61  ;;  %2370 = vmatprep.mubr.msk.bf16.mxu1 %vm2680_vm4, %v2679_v17 }
 0x590   : > { %2380 = vmatprep.subr.bf16.mxu1 %v2679_v17 }
 0x596   : > { %2371 = vmatmul.mubr.msk.bf16.vlgmr.msra.gmra.mxu1 %vm936_vm5, %v1290_v62 }
 0x597   : > { %2382 = vmatprep.mubr.msk.bf16.mxu1 %vm2680_vm4, %v2679_v17  ;;  %2381 = vmatpush3.bf16.msra.mxu1 %v1421_v45 }
 0x598   : > { %2392 = vmatprep.subr.bf16.mxu1 %v2679_v17 }
 0x646   : > { %v1282_v63 = vpop.f32.mrf.mxu0 }
 0x648   : > { %v2366_v0 = vpop.f32.mrf.mxu0 }
 0x64a   : > { %v1285_v1 = vpop.f32.mrf.mxu0 }
 0x64c   : > { %v2367_v4 = vpop.f32.mrf.mxu0 }
 0x64e   : > { %v1235_v5 = vpop.f32.mrf.mxu1 }
 0x64f   : > { %v3031_v6 = vadd.f32 %v1282_v63, %v1235_v5 }
 0x650   : > { %v2360_v7 = vpop.f32.mrf.mxu1 }
 0x652   : > { %v1238_v8 = vpop.f32.mrf.mxu1 }
 0x653   : > { %v3033_v9 = vadd.f32 %v1285_v1, %v1238_v8 }
 0x654   : > { %v2361_v10 = vpop.f32.mrf.mxu1 }
 0x656   : > { %v1333_v11 = vpop.f32.mrf.mxu1 }
 0x657   : > { %v1340_v12 = vmul.f32 0.35355338, %v1333_v11 }
 0x658   : > { %v2372_v13 = vpop.f32.mrf.mxu1 }
 0x659   : > { %v1342_v14 = vsel %vm986_vm6, %v1340_v12, -inf }
 0x65a   : > { %1343 = vmax.xlane.f32.xlu1 %v1342_v14  ;;  %v1336_v15 = vpop.f32.mrf.mxu1 }
 0x65b   : > { %v1341_v16 = vmul.f32 0.35355338, %v1336_v15 }
 0x65c   : > { %v2373_v18 = vpop.f32.mrf.mxu1 }
 0x65d   : > { %v1345_v19 = vsel %vm990_vm7, %v1341_v16, -inf }
 0x65e   : > { %1346 = vmax.xlane.f32.xlu0 %v1345_v19 }
 0x66b   : > { %1365 = vrot.lane.b32.xlu1 %v2974_v43, %s2689_s24  ;;  %s3280_s24 = smov (!%p2268_p1), %s3279_s21 }
 0x66f   : > { %1466 = vrot.lane.b32.xlu1 %v2974_v43, %s2690_s2 }
 0x6e3   : > { %v1344_v20 = vpop.xlane.xlu1 %1343 }
 0x6e4   : > { %v1348_v21 = vsub.f32 %v1340_v12, %v1344_v20 }
 0x6e6   : > { %v1350_v22 = vmul.f32 1.442695, %v1348_v21 }
 0x6e7   : > { %v1366_v23 = vpop.permute.xlu1 %1365  ;;  %v1347_v24 = vpop.xlane.xlu0 %1346 }
 0x6e8   : > { %2555 = vpow2.f32 %v1350_v22  ;;  %v1371_v25 = vand.u32 %v1366_v23, %v3002_v29  ;;  %v1349_v26 = vsub.f32 %v1341_v16, %v1347_v24 }
 0x6ea   : > { %v1352_v27 = vmul.f32 1.442695, %v1349_v26  ;;  %2375 = vmatpush3.bf16.msra.mxu0 %v1371_v25 }
 0x6eb   : > { %2386 = vmatprep.subr.bf16.mxu0 %v2679_v17  ;;  %v1467_v42 = vpop.permute.xlu1 %1466 }
 0x6ec   : > { %2557 = vpow2.f32 %v1352_v27 }
 0x6f5   : > { %v2556_v28 = vpop.eup %2555 }
 0x6f6   : > { %v1354_v30 = vsel %vm986_vm6, %v2556_v28, 0.0 }
 0x6f7   : > { %1355 = vadd.xlane.f32.xlu0 %v1354_v30 }
 0x6f9   : > { %v2558_v31 = vpop.eup %2557 }
 0x6fa   : > { %v1357_v32 = vsel %vm990_vm7, %v2558_v31, 0.0 }
 0x6fb   : > { %1358 = vadd.xlane.f32.xlu0 %v1357_v32 }
 0x711   : > { %1468 = vrot.lane.b32.xlu0 %v2974_v43, %s2691_s20 }
 0x780   : > { %v1356_v33 = vpop.xlane.xlu0 %1355 }
 0x781   : > { %2559 = vrcp.f32 %v1356_v33 }
 0x784   : > { %v1359_v34 = vpop.xlane.xlu0 %1358 }
 0x785   : > { %2561 = vrcp.f32 %v1359_v34 }
 0x788   : > { %v1469_v39 = vpop.permute.xlu0 %1468 }
 0x789   : > { %v1474_v41 = vsel %vm936_vm5, %v1469_v39, 0 }
 0x78e   : > { %v2560_v35 = vpop.eup %2559 }
 0x78f   : > { %v1362_v37 = vmul.f32 %v2560_v35, %v2556_v28 }
 0x792   : > { %v2562_v36 = vpop.eup %2561 }
 0x793   : > { %v1363_v38 = vmul.f32 %v2562_v36, %v2558_v31 }
 0x795   : > { %v1364_v40 = vpack.c.bf16 %v1363_v38, %v1362_v37 }
 0x797   : > { %2377 = vmatmul.mubr.msk.bf16.vlgmr.msra.gmra.mxu0 %vm986_vm6, %v1364_v40 }
 0x798   : > { %2387 = vmatpush3.bf16.xpose.msra.mxu0 %v1474_v41  ;;  %2388 = vmatprep.mubr.msk.bf16.mxu0 %vm2680_vm4, %v2679_v17 }
 0x799   : > { %2398 = vmatprep.subr.bf16.mxu0 %v2679_v17 }
 0x79f   : > { %2389 = vmatmul.mubr.msk.bf16.vlgmr.msra.gmra.mxu0 %vm936_vm5, %v1467_v42 }
 0x7a0   : > { %2400 = vmatprep.mubr.msk.bf16.mxu0 %vm2680_vm4, %v2679_v17 }
 0x857   : > { %v1407_v46 = vpop.f32.mrf.mxu0 }
 0x859   : > { %v2378_v47 = vpop.f32.mrf.mxu0 }
 0x85b   : > { %v1410_v48 = vpop.f32.mrf.mxu0 }
 0x85c   : > { %v1414_v49 = vpack.c.bf16 %v1410_v48, %v1407_v46 }
 0x85d   : > { %v2379_v50 = vpop.f32.mrf.mxu0 }
 0x85e   : > { %2383 = vmatmul.mubr.msk.bf16.vlgmr.msra.gmra.mxu1 %vm936_vm5, %v1414_v49 }
 0x85f   : > { %v1510_v51 = vpop.f32.mrf.mxu0  ;;  %2394 = vmatprep.mubr.msk.bf16.mxu1 %vm2680_vm4, %v2679_v17 }
 0x860   : > { %v1517_v52 = vmul.f32 0.35355338, %v1510_v51  ;;  %v2529_v51 = vld [vmem:[%s2913_s22 + $0x8] sm:$0xff]  }
 0x861   : > { %v2390_v53 = vpop.f32.mrf.mxu0 }
 0x862   : > { %v1519_v54 = vsel %vm986_vm6, %v1517_v52, -inf }
 0x863   : > { %1520 = vmax.xlane.f32.xlu1 %v1519_v54  ;;  %v1513_v55 = vpop.f32.mrf.mxu0 }
 0x864   : > { %v1518_v56 = vmul.f32 0.35355338, %v1513_v55 }
 0x865   : > { %v2391_v57 = vpop.f32.mrf.mxu0 }
 0x866   : > { %v1522_v58 = vsel %vm990_vm7, %v1518_v56, -inf }
 0x867   : > { %1523 = vmax.xlane.f32.xlu0 %v1522_v58 }
 0x8ec   : > { %v1521_v59 = vpop.xlane.xlu1 %1520 }
 0x8ed   : > { %v1525_v60 = vsub.f32 %v1517_v52, %v1521_v59  ;;  %v2530_v52 = vld [vmem:[%s2913_s22] sm:$0xff]   ;;  %s3277_s22 = scalar_lea.vmem %s3212_s7, %s2870_s0 }
 0x8ef   : > { %v1527_v61 = vmul.f32 1.442695, %v1525_v60 }
 0x8f0   : > { %v1524_v62 = vpop.xlane.xlu0 %1523 }
 0x8f1   : > { %2563 = vpow2.f32 %v1527_v61  ;;  %v1526_v63 = vsub.f32 %v1518_v56, %v1524_v62  ;;  %v2256_v61 = vld [vmem:[%s3277_s22] ss:$0 sm:$0xff] }
 0x8f3   : > { %v1529_v0 = vmul.f32 1.442695, %v1526_v63 }
 0x8f5   : > { %2565 = vpow2.f32 %v1529_v0 }
 0x8fe   : > { %v2564_v1 = vpop.eup %2563 }
 0x8ff   : > { %v1531_v4 = vsel %vm986_vm6, %v2564_v1, 0.0 }
 0x900   : > { %1532 = vadd.xlane.f32.xlu0 %v1531_v4 }
 0x902   : > { %v2566_v5 = vpop.eup %2565 }
 0x903   : > { %v1534_v7 = vsel %vm990_vm7, %v2566_v5, 0.0 }
 0x904   : > { %1535 = vadd.xlane.f32.xlu1 %v1534_v7 }
 0x916   : > { %1542 = vrot.lane.b32.xlu0 %v2974_v43, %s2692_s3 }
 0x91e   : > { %v1457_v8 = vpop.f32.mrf.mxu1 }
 0x91f   : > { %v1464_v10 = vadd.f32 %v1457_v8, %v3031_v6 }
 0x920   : > { %v2384_v11 = vpop.f32.mrf.mxu1 }
 0x921   : > { %v2532_v11 = vld [vmem:[%s2927_s28 + $0x10] sm:$0xff]  }
 0x922   : > { %v1460_v12 = vpop.f32.mrf.mxu1 }
 0x923   : > { %v1465_v13 = vadd.f32 %v1460_v12, %v3033_v9  ;;  %v2253_v9 = vld [vmem:[%s2896_s29 + $0xc] sm:$0xf]  ;;  %s3276_s29 = scalar_lea.vmem %s3211_s6, %s2870_s0 }
 0x924   : > { %v2385_v14 = vpop.f32.mrf.mxu1  ;;  %v1598_v23 = vsel %vm1197_vm10, %v2253_v9, 0  ;;  %v2255_v31 = vld [vmem:[%s3276_s29] ss:$0 sm:$0xff]  ;;  %v2533_v12 = vld [vmem:[%s2927_s28 + $0x8] sm:$0xff]  }
 0x925   : > { %2399 = vmatpush3.bf16.msra.mxu0 %v1598_v23  ;;  %v2258_v14 = vld [vmem:[%s795_s26] ss:$0 sm:$0xff] }
 0x926   : > { %2412 = vmatprep.subr.bf16.mxu0 %v2679_v17 }
 0x989   : > { %v1533_v15 = vpop.xlane.xlu0 %1532 }
 0x98a   : > { %2567 = vrcp.f32 %v1533_v15 }
 0x98d   : > { %v1536_v16 = vpop.xlane.xlu1 %1535  ;;  %v1543_v18 = vpop.permute.xlu0 %1542 }
 0x98e   : > { %2569 = vrcp.f32 %v1536_v16  ;;  %v1548_v19 = vand.u32 %v1543_v18, %v3002_v29 }
 0x990   : > { %2393 = vmatpush3.bf16.msra.mxu1 %v1548_v19 }
 0x991   : > { %2404 = vmatprep.subr.bf16.mxu1 %v2679_v17 }
 0x997   : > { %v2568_v43 = vpop.eup %2567 }
 0x998   : > { %v1539_v21 = vmul.f32 %v2568_v43, %v2564_v1  ;;  %v2257_v1 = vld [vmem:[%s787_s17] ss:$0 sm:$0xff] }
 0x99b   : > { %v2570_v20 = vpop.eup %2569 }
 0x99c   : > { %v1540_v6 = vmul.f32 %v2570_v20, %v2566_v5 }
 0x99e   : > { %v1541_v22 = vpack.c.bf16 %v1540_v6, %v1539_v21 }
 0x9a0   : > { %2395 = vmatmul.mubr.msk.bf16.vlgmr.msra.gmra.mxu1 %vm986_vm6, %v1541_v22 }
 0x9a1   : > { %2408 = vmatprep.mubr.msk.bf16.mxu1 %vm2680_vm4, %v2679_v17  ;;  %2405 = vmatpush3.bf16.msra.mxu1 %v2529_v51 }
 0x9a2   : > { %2406 = vmatprep.subr.bf16.mxu1 %v2679_v17 }
 0x9a5   : > { %2407 = vmatpush3.bf16.msra.mxu1 %v2530_v52 }
 0xa60   : > { %v1584_v29 = vpop.f32.mrf.mxu1 }
 0xa62   : > { %v2396_v24 = vpop.f32.mrf.mxu1 }
 0xa64   : > { %v1587_v25 = vpop.f32.mrf.mxu1 }
 0xa65   : > { %v1591_v26 = vpack.c.bf16 %v1587_v25, %v1584_v29 }
 0xa66   : > { %v2397_v27 = vpop.f32.mrf.mxu1 }
 0xa67   : > { %2401 = vmatmul.mubr.msk.bf16.vlgmr.msra.gmra.mxu0 %vm936_vm5, %v1591_v26 }
 0xa68   : > { %2420 = vmatprep.mubr.msk.bf16.mxu0 %vm2680_vm4, %v2679_v17 }
 0xb27   : > { %v1634_v28 = vpop.f32.mrf.mxu0 }
 0xb28   : > { %v1641_v30 = vadd.f32 %v1634_v28, %v1464_v10  ;;  %v2531_v10 = vld [vmem:[%s2927_s28 + $0x18] sm:$0xff]  }
 0xb29   : > { %v2402_v32 = vpop.f32.mrf.mxu0  ;;  %2413 = vmatpush3.bf16.msra.mxu0 %v2531_v10 }
 0xb2a   : > { %v1643_v33 = vadd.f32 %v1641_v30, %v2934_v2  ;;  %2414 = vmatprep.subr.bf16.mxu0 %v2679_v17 }
 0xb2b   : > { %v1637_v34 = vpop.f32.mrf.mxu0 }
 0xb2c   : > { %v3082_v35 = vadd.f32 %v2255_v31, %v1643_v33  ;;  %v1642_v36 = vadd.f32 %v1637_v34, %v1465_v13  ;;  %v2534_v13 = vld [vmem:[%s2927_s28] sm:$0xff]  }
 0xb2d   : > { %v2403_v37 = vpop.f32.mrf.mxu0  ;;  %2415 = vmatpush3.bf16.msra.mxu0 %v2532_v11 }
 0xb2e   : > { %v1644_v38 = vadd.f32 %v1642_v36, %v2936_v3  ;;  %v1656_v39 = vsel %vm819_vm2, %v3082_v35, 0.0  ;;  %2416 = vmatprep.subr.bf16.mxu0 %v2679_v17 }
 0xb2f   : > { %1657 = vadd.xlane.f32.xlu1 %v1656_v39 }
 0xb30   : > { %v3087_v40 = vadd.f32 %v2255_v31, %v1644_v38  ;;  %v2262_v38 = vld [vmem:[%s803_s19] ss:$0 sm:$0xff] }
 0xb31   : > { %2417 = vmatpush3.bf16.msra.mxu0 %v2533_v12 }
 0xb32   : > { %v1659_v41 = vsel %vm823_vm3, %v3087_v40, 0.0  ;;  %2418 = vmatprep.subr.bf16.mxu0 %v2679_v17 }
 0xb33   : > { %1660 = vadd.xlane.f32.xlu1 %v1659_v41 }
 0xb35   : > { %2419 = vmatpush3.bf16.msra.mxu0 %v2534_v13 }
 0xbb8   : > { %v1658_v2 = vpop.xlane.xlu1 %1657 }
 0xbb9   : > { %v1662_v42 = vmul.f32 0.03125, %v1658_v2 }
 0xbbb   : > { %v1664_v44 = vsub.f32 %v3082_v35, %v1662_v42 }
 0xbbc   : > { %v1661_v45 = vpop.xlane.xlu1 %1660 }
 0xbbd   : > { %v1663_v46 = vmul.f32 0.03125, %v1661_v45  ;;  %v1666_v47 = vmul.f32 %v1664_v44, %v1664_v44 }
 0xbbf   : > { %v1665_v3 = vsub.f32 %v3087_v40, %v1663_v46  ;;  %v1668_v48 = vsel %vm819_vm2, %v1666_v47, 0.0 }
 0xbc0   : > { %1669 = vadd.xlane.f32.xlu1 %v1668_v48 }
 0xbc1   : > { %v1667_v49 = vmul.f32 %v1665_v3, %v1665_v3 }
 0xbc3   : > { %v1671_v50 = vsel %vm823_vm3, %v1667_v49, 0.0 }
 0xbc4   : > { %1672 = vadd.xlane.f32.xlu1 %v1671_v50 }
 0xc49   : > { %v1670_v53 = vpop.xlane.xlu1 %1669 }
 0xc4a   : > { %v1674_v54 = vmul.f32 0.03125, %v1670_v53 }
 0xc4c   : > { %v1676_v55 = vadd.f32 1e-12, %v1674_v54 }
 0xc4d   : > { %v1673_v56 = vpop.xlane.xlu1 %1672 }
 0xc4e   : > { %2571 = vrsqrt.f32 %v1676_v55  ;;  %v1675_v57 = vmul.f32 0.03125, %v1673_v56 }
 0xc50   : > { %v1677_v58 = vadd.f32 1e-12, %v1675_v57 }
 0xc52   : > { %2573 = vrsqrt.f32 %v1677_v58 }
 0xc5b   : > { %v2572_v59 = vpop.eup %2571 }
 0xc5c   : > { %v1680_v60 = vmul.f32 %v2572_v59, %v1664_v44 }
 0xc5e   : > { %v1688_v0 = vmul.f32 %v2256_v61, %v1680_v60 }
 0xc5f   : > { %v2574_v62 = vpop.eup %2573 }
 0xc60   : > { %v1681_v63 = vmul.f32 %v2574_v62, %v1665_v3  ;;  %v1696_v5 = vadd.f32 %v2257_v1, %v1688_v0 }
 0xc62   : > { %v1689_v4 = vmul.f32 %v2256_v61, %v1681_v63 }
 0xc64   : > { %v1697_v7 = vadd.f32 %v2257_v1, %v1689_v4 }
 0xc66   : > { %v1698_v8 = vpack.c.bf16 %v1697_v7, %v1696_v5 }
 0xc68   : > { %2409 = vmatmul.mubr.msk.bf16.vlgmr.msra.gmra.mxu1 %vm819_vm2, %v1698_v8 }
 0xd28   : > { %v1759_v15 = vpop.f32.mrf.mxu1 }
 0xd29   : > { %v1760_v16 = vadd.f32 %v2258_v14, %v1759_v15 }
 0xd2a   : > { %v2410_v18 = vpop.f32.mrf.mxu1 }
 0xd2b   : > { %v1768_v19 = vmul.f32 0.044715, %v1760_v16  ;;  %v1766_v31 = vmul.f32 0.5, %v1760_v16 }
 0xd2c   : > { %v1762_v43 = vpop.f32.mrf.mxu1 }
 0xd2d   : > { %v1770_v20 = vmul.f32 %v1768_v19, %v1760_v16  ;;  %v1763_v21 = vadd.f32 %v2258_v14, %v1762_v43 }
 0xd2e   : > { %v2411_v6 = vpop.f32.mrf.mxu1 }
 0xd2f   : > { %v1772_v22 = vmul.f32 %v1770_v20, %v1760_v16  ;;  %v1769_v9 = vmul.f32 0.044715, %v1763_v21  ;;  %v1767_v32 = vmul.f32 0.5, %v1763_v21 }
 0xd31   : > { %v1774_v23 = vadd.f32 %v1772_v22, %v1760_v16  ;;  %v1771_v29 = vmul.f32 %v1769_v9, %v1763_v21 }
 0xd33   : > { %v1776_v24 = vmul.f32 0.7978846, %v1774_v23  ;;  %v1773_v17 = vmul.f32 %v1771_v29, %v1763_v21 }
 0xd35   : > { %2575 = vtanh.f32 %v1776_v24  ;;  %v1775_v25 = vadd.f32 %v1773_v17, %v1763_v21 }
 0xd37   : > { %v1777_v26 = vmul.f32 0.7978846, %v1775_v25 }
 0xd39   : > { %2577 = vtanh.f32 %v1777_v26 }
 0xd42   : > { %v2576_v27 = vpop.eup %2575 }
 0xd43   : > { %v1780_v28 = vadd.f32 1.0, %v2576_v27 }
 0xd45   : > { %v1782_v34 = vmul.f32 %v1780_v28, %v1766_v31 }
 0xd46   : > { %v2578_v30 = vpop.eup %2577 }
 0xd47   : > { %v1781_v33 = vadd.f32 1.0, %v2578_v30 }
 0xd49   : > { %v1783_v36 = vmul.f32 %v1781_v33, %v1767_v32 }
 0xd4b   : > { %v1784_v37 = vpack.c.bf16 %v1783_v36, %v1782_v34 }
 0xd4d   : > { %2421 = vmatmul.mubr.msk.bf16.vlgmr.msra.gmra.mxu0 %vm1824_vm11, %v1784_v37 }
 0xe0d   : > { %v1862_v39 = vpop.f32.mrf.mxu0 }
 0xe0e   : > { %v1863_v41 = vadd.f32 %v2262_v38, %v1862_v39 }
 0xe0f   : > { %v2422_v2 = vpop.f32.mrf.mxu0 }
 0xe10   : > { %v1869_v42 = vadd.f32 %v1863_v41, %v3082_v35 }
 0xe11   : > { %v1865_v44 = vpop.f32.mrf.mxu0 }
 0xe12   : > { %1871 = vst.msk [vmem:[#allocation2] sm:$0xff] %vm819_vm2, %v1869_v42  ;;  %v1866_v45 = vadd.f32 %v2262_v38, %v1865_v44  ;;  %1876 = sbr.rel (%p2268_p1) target bundleno = 4314 (0x10da), region = 104 }
 0xe13   : > { %v2423_v46 = vpop.f32.mrf.mxu0 }
 0xe14   : > { %v1870_v47 = vadd.f32 %v1866_v45, %v3087_v40 }
 0xe16   : > { %1872 = vst.msk [vmem:[#allocation2 + $0x8] sm:$0x1f] %vm823_vm3, %v1870_v47 }
 0xe17   : > { %vm1879_vm12 = vcmask 253952   ;;  %v2579_v52 = vld [vmem:[%s3279_s21 + $0x8] sm:$0xff]   ;;  %v2693_v53 = vmov 0.0   ;;  %vm2694_vm13 = vmmov 0   ;;  %v2580_v40 = vld [vmem:[%s3280_s24] sm:$0xff]   ;;  %s3285_s21 = sld [smem:[#allocation27_spill]] }
 0xe18   : > { %v1880_v3 = vsel %vm1879_vm12, %v1869_v42, 0.0  ;;  %2424 = vmatprep.subr.bf16.mxu0 %v2693_v53  ;;  %2428 = vmatprep.mubr.msk.bf16.mxu0 %vm2694_vm13, %v2693_v53  ;;  %v2581_v54 = vld [vmem:[%s3281_s27 + $0x8] sm:$0xff]   ;;  %v1877_v59 = vld [vmem:[%s3282_s18] sm:$0x1]  ;;  %vm2017_vm14 = vcmask 8192  }
 0xe19   : > { %1881 = vadd.xlane.f32.xlu0 %v1880_v3  ;;  %2425 = vmatpush3.bf16.msra.mxu0 %v2579_v52  ;;  %v1878_v61 = vld [vmem:[%s3283_s16] sm:$0x1] }
 0xe1a   : > { %2432 = vmatprep.subr.bf16.mxu1 %v2693_v53  ;;  %2426 = vmatprep.subr.bf16.mxu0 %v2693_v53  ;;  %v2582_v1 = vld [vmem:[%s3281_s27] sm:$0xff]  }
 0xe1b   : > { %2436 = vmatprep.mubr.msk.bf16.mxu1 %vm2694_vm13, %v2693_v53  ;;  %2433 = vmatpush3.bf16.msra.mxu1 %v2581_v54  ;;  %v1900_v4 = vld [vmem:[%s3284_s25] sm:$0x1] }
 0xe1c   : > { %2434 = vmatprep.subr.bf16.mxu1 %v2693_v53 }
 0xe1d   : > { %2427 = vmatpush3.bf16.msra.mxu0 %v2580_v40  ;;  %v1961_v13 = vld [vmem:[%s3285_s21] sm:$0x1] }
 0xe1f   : > { %2435 = vmatpush3.bf16.msra.mxu1 %v2582_v1 }
 0xea2   : > { %v1882_v48 = vpop.xlane.xlu0 %1881 }
 0xea3   : > { %v1883_v49 = vmul.f32 0.03125, %v1882_v48 }
 0xea5   : > { %v1884_v50 = vsub.f32 %v1869_v42, %v1883_v49 }
 0xea7   : > { %v1885_v51 = vmul.f32 %v1884_v50, %v1884_v50 }
 0xea9   : > { %v1886_v35 = vsel %vm1879_vm12, %v1885_v51, 0.0 }
 0xeaa   : > { %1887 = vadd.xlane.f32.xlu0 %v1886_v35 }
 0xf33   : > { %v1888_v55 = vpop.xlane.xlu0 %1887 }
 0xf34   : > { %v1889_v56 = vmul.f32 0.03125, %v1888_v55 }
 0xf36   : > { %v1890_v57 = vadd.f32 1e-12, %v1889_v56 }
 0xf38   : > { %2583 = vrsqrt.f32 %v1890_v57 }
 0xf45   : > { %v2584_v58 = vpop.eup %2583 }
 0xf46   : > { %v1892_v60 = vmul.f32 %v2584_v58, %v1884_v50 }
 0xf48   : > { %v1893_v62 = vmul.f32 %v1892_v60, %v1877_v59 }
 0xf4a   : > { %v1894_v63 = vadd.f32 %v1893_v62, %v1878_v61 }
 0xf4c   : > { %v1895_v0 = vpack.c.bf16 %v1894_v63, %v1894_v63 }
 0xf4e   : > { %2429 = vmatmul.mubr.msk.bf16.vlgmr.msra.gmra.mxu0 %vm819_vm2, %v1895_v0 }
0x100e   : > { %v1950_v5 = vpop.f32.mrf.mxu0 }
0x100f   : > { %v1951_v7 = vadd.f32 %v1950_v5, %v1900_v4 }
0x1010   : > { %v2430_v8 = vpop.f32.mrf.mxu0 }
0x1011   : > { %v1956_v10 = vpack.c.bf16 %v1951_v7, %v1951_v7 }
0x1012   : > { %v1953_v11 = vpop.f32.mrf.mxu0 }
0x1013   : > { %2437 = vmatmul.mubr.msk.bf16.vlgmr.msra.gmra.mxu1 %vm819_vm2, %v1956_v10 }
0x1014   : > { %v2431_v12 = vpop.f32.mrf.mxu0 }
0x10d3   : > { %v2011_v14 = vpop.f32.mrf.mxu1 }
0x10d4   : > { %v2012_v15 = vadd.f32 %v2011_v14, %v1961_v13 }
0x10d5   : > { %v2438_v16 = vpop.f32.mrf.mxu1 }
0x10d6   : > { %2018 = vst.msk [vmem:[%s2931_s14] sm:$0x1] %vm2017_vm14, %v2012_v15 }
0x10d7   : > { %v2014_v18 = vpop.f32.mrf.mxu1 }
0x10d9   : > { %v2439_v19 = vpop.f32.mrf.mxu1 }
0x10da PF: > { %s3286_s2 = sld [smem:[#allocation9_spill]]  ;;  %s2032_s22 = sshll.u32 %s2931_s14, 4  ;;  %s2033_s22 = int_to_ptr.vmem [resolvable:$true] %s2032_s22 }
0x10db   : > { %s3288_s13 = sld [smem:[#allocation28_spill]]  ;;  %s3289_s15 = sand.u32 1, %s2653_s30  }
0x10dc   : > { %s2020_s16 = scalar_lea.sflag [#allocation4], %s3289_s15  ;;  %s2585_s17 = scalar_lea.vmem %s2033_s22, 16 }
0x10dd   : > { %p2586_p2 = scmp.ne.s32.totalorder %s2033_s22, %s2585_s17  ;;  %s2695_s23 = smov [#allocation3]  }
0x10de   : > { %s2589_s26 = sshll.u32 %s2695_s23, 4  ;;  %s2590_s26 = int_to_ptr.vmem [resolvable:$false] %s2589_s26 }
0x10df   : > { %p2587_p4 = pnand %p2586_p2, %p2845_p3  ;;  %s2591_s28 = scalar_lea.vmem %s2590_s26, 32 }
0x10e0   : > { %s2275_s3 = sshll.u32 %s3286_s2, 4  ;;  %p2592_p6 = scmp.lt.s32.totalorder %s2033_s22, %s2590_s26 }
0x10e1   : > { %s2030_s18 = scalar_lea.hbm %s3288_s13, %s2275_s3  ;;  %p2588_p5 = pneg %p2587_p4 }
0x10e2   : > { %p2593_p7 = scmp.lt.s32.totalorder %s2591_s28, %s2585_s17 }
0x10e4   : > { %p2594_p8 = por %p2593_p7, %p2592_p6 }
0x10e6   : > { %p2595_p10 = pnand %p2594_p8, %p2588_p5 }
0x10e8   : > { %2598 = shalt.err (!%p2595_p10)
}
0x10e9   : > { %s2599_s25 = scalar_lea.hbm %s2030_s18, 16  ;;  %s2603_s19 = scalar_lea.hbm %s3288_s13, 32 }
0x10ea   : > { %p2600_p11 = scmp.ne.s32.totalorder %s2030_s18, %s2599_s25  ;;  %p2604_p0 = scmp.lt.s32.totalorder %s2030_s18, %s3288_s13 }
0x10eb   : > { %p2605_p1 = scmp.lt.s32.totalorder %s2603_s19, %s2599_s25 }
0x10ec   : > { %p2601_p12 = pnand %p2600_p11, %p2845_p3 }
0x10ed   : > { %p2606_p2 = por %p2605_p1, %p2604_p0 }
0x10ee   : > { %p2602_p13 = pneg %p2601_p12 }
0x10f0   : > { %p2607_p4 = pnand %p2606_p2, %p2602_p13 }
0x10f2   : > { %2610 = shalt.err (!%p2607_p4)
}
0x10f3   : > { %2440 = dma.vmem_to_hbm [thread:$0]  (%p2845_p3), %s2033_s22, 16, %s2030_s18, %s2020_s16  }
0x10f4 PF: > { %s3290_s3 = sld [smem:[#allocation12_spill]] }
0x10f5   : > { %s3291_s1 = sld [smem:[#allocation6_spill]] }
0x10fa   : > { %p2446_p5 = scmp.ge.s32.totalorder %s3290_s3, 2 }
0x10fb   : > { %s2044_s15 = sand.u32 1, %s3291_s1  }
0x10fc   : > { %p2443_p6 = pnand %p2446_p5, %p2855_p9  ;;  %s2045_s17 = scalar_lea.sflag [#allocation4], %s2044_s15 }
0x10fe   : > { %p2444_p7 = pneg %p2443_p6 }
0x1100   : > { %2644 = dma.done.wait (%p2444_p7), %s2045_s17, 16  }
0x1101   : > { %2646 = vsyncadd (%p2444_p7), %s2045_s17, 4294967280  ;;  %s32_s23 = sadd.s32 1, %s3290_s3   ;;  %s3293_s26 = sld [smem:[#allocation7_spill]] }
0x1102   : > { %p29_p8 = scmp.ge.s32.totalorder %s32_s23, 6   ;;  %s3294_s20 = sld [smem:[#allocation17_spill]] }
0x1103   : > { %s3295_s21 = sld [smem:[#allocation10_spill]]  ;;  %s3299_s0 = smov %s2653_s30 }
0x1104   : > { %s3296_s1 = sld [smem:[#allocation11_spill]]  ;;  %31 = sbr.rel (!%p29_p8) target bundleno = 17 (0x11), region = 178 }
0x1105   : > { %s3297_s22 = sld [smem:[#allocation13_spill]] }
0x1106   : > { %s3298_s2 = sld [smem:[#allocation15_spill]] }
0x1107   : > { %s3300_s30 = smov %s3293_s26 }
0x1109   :  { %2049 = vsyncpa [#allocation4], 1 }
0x110a   :  { %2051 = vsyncpa [#allocation4 + $0x1], 1 }

</bundles_post_ra>
